<compile_context>
chip_gen: v5e
topology: v5e:2x2
jax: 0.10.0
libtpu: 0.0.40
codegen_flags: <defaults>
</compile_context>

<pallas_src>
import functools

import jax
import jax.numpy as jnp
from jax import lax
from jax.experimental import pallas as pl
from jax.experimental.pallas import tpu as pltpu


_RATE = 3                                         # DSConv dilation rate
_TAPS = [(ky, kx) for ky in range(3) for kx in range(3)]   # t = ky*3 + kx


# ----------------------------------------------------------------------------
# Fused per-image kernel: conv+BN+ReLU+pool (both branches) + channel chain
# + elementwise apply epilogue.
# ----------------------------------------------------------------------------
def _dafm_kernel(rgb_ref, depth_ref, mask_ref, wc_ref, bc_ref, wf_ref, bf_ref,
                 out_ref, *, H, W):
    HW = H * W

    def conv_bn_relu_pool(x, branch):
        # x: (Cin, H*W) lane-dense.  Dilated 3x3 conv (rate=3, pad=3) as 9
        # accumulated matmuls; tap(dy,dx)[p] = x[p + dy*W + dx] with the
        # out-of-image positions zeroed by the precomputed mask.  The shift
        # rides the XLU (roll), the mask-mul the VPU, the dot the MXU.
        acc = None
        for t, (ky, kx) in enumerate(_TAPS):
            off = _RATE * (ky - 1) * W + _RATE * (kx - 1)
            if off == 0:
                tap = x                                     # center tap, no mask
            else:
                tap = pltpu.roll(x, (-off) % HW, 1) * mask_ref[t]
            contrib = jnp.dot(wc_ref[branch * 9 + t], tap,
                              preferred_element_type=jnp.float32)
            acc = contrib if acc is None else acc + contrib
        y = jnp.maximum(acc + bc_ref[branch], 0.0)          # folded BN + ReLU
        return jnp.mean(y, axis=1, keepdims=True)           # global avg pool (C,1)

    pooled_r = conv_bn_relu_pool(rgb_ref[0], 0)
    pooled_d = conv_bn_relu_pool(depth_ref[0], 1)

    # Tiny per-image channel chain (spatial size 1x1 throughout).  A rate-3
    # 3x3 conv on a 1x1 input only sees its center tap, so conv_3 / conv_4
    # reduce to (C x C) matvecs with the center-tap weights.
    def fc(idx, x_col):
        return jnp.dot(wf_ref[idx], x_col,
                       preferred_element_type=jnp.float32) + bf_ref[idx]

    fr_sa = jnp.maximum(fc(0, pooled_r), 0.0)   # SA_module_rgb (1x1 conv+BN+ReLU)
    fd_sa = jnp.maximum(fc(1, pooled_d), 0.0)   # SA_module_depth
    fusion_r = jnp.maximum(fc(2, fr_sa), 0.0)   # conv_3 (MaxPool2d(1)+ReLU no-ops)
    z = jnp.maximum(fc(3, fd_sa), 0.0)          # conv_4 DSConv
    fusion_d = 1.0 / (1.0 + jnp.exp(-z))        # + Sigmoid

    # F_out = 2*(rgb*fusion_r)*fusion_r[0]*(depth*fusion_d)*fusion_d[1]
    #       = rgb * depth * scale.  Exact because fusion_r / fusion_d are
    #   spatially constant (they come from the 1x1 pooled path).
    scale = (2.0 * fusion_r * fusion_d
             * fusion_r[0:1, 0:1] * fusion_d[1:2, 0:1])      # (C, 1)

    # Fused elementwise apply: rgb / depth blocks are already VMEM resident.
    out_ref[0] = (rgb_ref[0] * depth_ref[0] * scale).astype(out_ref.dtype)


# ----------------------------------------------------------------------------
# Glue: BN folding, weight reshapes, border masks, wrapper.
# ----------------------------------------------------------------------------
def _fold_bn(gamma, beta, mean, var, eps=1e-5):
    s = gamma / jnp.sqrt(var + eps)
    return s, beta - mean * s


def _conv_tap_stack(w_oihw, scale):
    # (Cout, Cin, 3, 3) -> (9, Cout, Cin), tap order t = ky*3 + kx, with the
    # per-output-channel BN scale folded into the rows.
    cout, cin = w_oihw.shape[0], w_oihw.shape[1]
    w = jnp.transpose(w_oihw, (2, 3, 0, 1)).reshape(9, cout, cin)
    return (w * scale[None, :, None]).astype(jnp.float32)


def _tap_masks(H, W):
    # (9, 1, H*W) 0/1 masks: tap t is valid where the shifted row AND column
    # both stay inside the image (kills roll wrap-around + column bleed).
    hw = H * W
    row = jnp.arange(hw, dtype=jnp.int32) // W
    col = jnp.arange(hw, dtype=jnp.int32) % W
    masks = []
    for ky, kx in _TAPS:
        dy, dx = _RATE * (ky - 1), _RATE * (kx - 1)
        valid = ((row + dy >= 0) & (row + dy < H)
                 & (col + dx >= 0) & (col + dx < W))
        masks.append(valid.astype(jnp.float32))
    return jnp.stack(masks).reshape(9, 1, hw)


def dafm_forward(rgb, depth, p):
    """rgb, depth: (N, C, H, W) float32  ->  (N, C, H, W) float32."""
    N, C, H, W = rgb.shape
    HW = H * W

    # Fold eval-mode BN into per-output-channel scale + bias.
    s_r, b_r = _fold_bn(*p["bn_rgb"])
    s_d, b_d = _fold_bn(*p["bn_depth"])
    s_sar, b_sar = _fold_bn(*p["bn_sa_rgb"])
    s_sad, b_sad = _fold_bn(*p["bn_sa_depth"])
    s_c3, b_c3 = _fold_bn(*p["bn_c3"])
    s_c4, b_c4 = _fold_bn(*p["bn_c4"])

    w_conv = jnp.concatenate([_conv_tap_stack(p["w_rgb"], s_r),
                              _conv_tap_stack(p["w_depth"], s_d)])   # (18,C,C)
    b_conv = jnp.stack([b_r, b_d]).reshape(2, C, 1).astype(jnp.float32)

    w_fuse = jnp.stack([
        p["w_sa_rgb"][:, :, 0, 0] * s_sar[:, None],
        p["w_sa_depth"][:, :, 0, 0] * s_sad[:, None],
        p["w_c3"][:, :, 1, 1] * s_c3[:, None],    # only the center tap hits
        p["w_c4"][:, :, 1, 1] * s_c4[:, None],    # the 1x1 SA output
    ]).astype(jnp.float32)                                            # (4,C,C)
    b_fuse = jnp.stack([b_sar, b_sad, b_c3, b_c4]
                       ).reshape(4, C, 1).astype(jnp.float32)

    mask = _tap_masks(H, W)

    # Rough VMEM footprint (bytes): 3 double-buffered (C,HW) streams,
    # 2 (C,HW) f32 temporaries (acc + shifted tap), weights + masks x2.
    vmem_est = 4 * (6 * C * HW + 2 * C * HW
                    + 2 * (22 * C * C + 6 * C + 9 * HW))
    vmem_limit = None
    if vmem_est > (32 << 20):
        vmem_limit = min(vmem_est + (4 << 20), 64 << 20)

    rgb_f = rgb.reshape(N, C, HW)
    depth_f = depth.reshape(N, C, HW)

    out_flat = pl.pallas_call(
        functools.partial(_dafm_kernel, H=H, W=W),
        out_shape=jax.ShapeDtypeStruct((N, C, HW), jnp.float32),
        grid=(N,),
        in_specs=[
            pl.BlockSpec((1, C, HW), lambda n: (n, 0, 0)),     # rgb
            pl.BlockSpec((1, C, HW), lambda n: (n, 0, 0)),     # depth
            pl.BlockSpec((9, 1, HW), lambda n: (0, 0, 0)),     # tap masks
            pl.BlockSpec((18, C, C), lambda n: (0, 0, 0)),     # conv weights
            pl.BlockSpec((2, C, 1), lambda n: (0, 0, 0)),      # conv biases
            pl.BlockSpec((4, C, C), lambda n: (0, 0, 0)),      # fuse weights
            pl.BlockSpec((4, C, 1), lambda n: (0, 0, 0)),      # fuse biases
        ],
        out_specs=pl.BlockSpec((1, C, HW), lambda n: (n, 0, 0)),
        compiler_params=pltpu.CompilerParams(
            dimension_semantics=("parallel",),
            vmem_limit_bytes=vmem_limit),
    )(rgb_f, depth_f, mask, w_conv, b_conv, w_fuse, b_fuse)

    return out_flat.reshape(N, C, H, W)


# ----------------------------------------------------------------------------
# Pure-JAX reference (mirrors the PyTorch forward, eval-mode BN).
# ----------------------------------------------------------------------------
def dafm_reference(rgb, depth, p, eps=1e-5):
    def bn(x, g, b, m, v):
        return ((x - m[None, :, None, None])
                / jnp.sqrt(v[None, :, None, None] + eps)
                * g[None, :, None, None] + b[None, :, None, None])

    def dsconv(x, w, bnp, rate=3):
        y = lax.conv_general_dilated(
            x, w, (1, 1), ((rate, rate), (rate, rate)),
            rhs_dilation=(rate, rate),
            dimension_numbers=("NCHW", "OIHW", "NCHW"),
            precision=lax.Precision.HIGHEST)
        return jnp.maximum(bn(y, *bnp), 0.0)

    def sa(x, w, bnp):
        pooled = jnp.mean(x, axis=(2, 3), keepdims=True)
        y = lax.conv_general_dilated(
            pooled, w, (1, 1), ((0, 0), (0, 0)),
            dimension_numbers=("NCHW", "OIHW", "NCHW"),
            precision=lax.Precision.HIGHEST)
        return jnp.maximum(bn(y, *bnp), 0.0)

    Fr = dsconv(rgb, p["w_rgb"], p["bn_rgb"])
    Fd = dsconv(depth, p["w_depth"], p["bn_depth"])
    Fr = sa(Fr, p["w_sa_rgb"], p["bn_sa_rgb"])
    Fd = sa(Fd, p["w_sa_depth"], p["bn_sa_depth"])
    fusion_r = jnp.maximum(dsconv(Fr, p["w_c3"], p["bn_c3"]), 0.0)  # MaxPool2d(1)=id
    fusion_d = jax.nn.sigmoid(dsconv(Fd, p["w_c4"], p["bn_c4"]))
    weight_rgb = fusion_r[:, 0:1, :, :]
    weight_depth = fusion_d[:, 1:2, :, :]
    Fr_out = rgb * fusion_r
    Fd_out = depth * fusion_d
    t = Fr_out * weight_rgb * Fd_out * weight_depth
    return t + t


# ----------------------------------------------------------------------------
# Deterministic parameter construction + test run.
# ----------------------------------------------------------------------------
def make_params(key, c):
    ks = jax.random.split(key, 12)

    def conv_w(k, kh, kw):
        return 0.2 * jax.random.normal(k, (c, c, kh, kw), jnp.float32)

    def bn_p(k):
        k1, k2, k3, k4 = jax.random.split(k, 4)
        gamma = 1.0 + 0.1 * jax.random.normal(k1, (c,), jnp.float32)
        beta = 0.1 * jax.random.normal(k2, (c,), jnp.float32)
        mean = 0.1 * jax.random.normal(k3, (c,), jnp.float32)
        var = 1.0 + 0.1 * jnp.abs(jax.random.normal(k4, (c,), jnp.float32))
        return (gamma, beta, mean, var)

    return {
        "w_rgb": conv_w(ks[0], 3, 3),      "bn_rgb": bn_p(ks[1]),
        "w_depth": conv_w(ks[2], 3, 3),    "bn_depth": bn_p(ks[3]),
        "w_sa_rgb": conv_w(ks[4], 1, 1),   "bn_sa_rgb": bn_p(ks[5]),
        "w_sa_depth": conv_w(ks[6], 1, 1), "bn_sa_depth": bn_p(ks[7]),
        "w_c3": conv_w(ks[8], 3, 3),       "bn_c3": bn_p(ks[9]),
        "w_c4": conv_w(ks[10], 3, 3),      "bn_c4": bn_p(ks[11]),
    }


if __name__ == "__main__":
    N, C, H, W = 2, 4, 16, 16          # input_dim == output_dim == 4
    key = jax.random.PRNGKey(0)
    k_rgb, k_depth, k_par = jax.random.split(key, 3)
    rgb = jax.random.normal(k_rgb, (N, C, H, W), jnp.float32)
    depth = jax.random.normal(k_depth, (N, C, H, W), jnp.float32)
    params = make_params(k_par, C)

    out = jax.block_until_ready(dafm_forward(rgb, depth, params))
    ref = jax.block_until_ready(dafm_reference(rgb, depth, params))
    assert out.shape == (N, C, H, W)
    max_err = float(jnp.max(jnp.abs(out - ref)))
    assert jnp.allclose(out, ref, atol=1e-4, rtol=1e-4), max_err

    print("KERNEL_OK")
</pallas_src>

<mosaic_0001>
module attributes {stable_mosaic.version = 11 : i64} {
  func.func @_dafm_kernel(%arg0: i32, %arg1: memref<1x4x256xf32, #tpu.memory_space<vmem>>, %arg2: memref<1x4x256xf32, #tpu.memory_space<vmem>>, %arg3: memref<9x1x256xf32, #tpu.memory_space<vmem>>, %arg4: memref<18x4x4xf32, #tpu.memory_space<vmem>>, %arg5: memref<2x4x1xf32, #tpu.memory_space<vmem>>, %arg6: memref<4x4x4xf32, #tpu.memory_space<vmem>>, %arg7: memref<4x4x1xf32, #tpu.memory_space<vmem>>, %arg8: memref<1x4x256xf32, #tpu.memory_space<vmem>>) attributes {dimension_semantics = [#tpu.dimension_semantics<parallel>], iteration_bounds = array<i64: 2>, scalar_prefetch = 0 : i64, scratch_operands = 0 : i64, tpu.core_type = #tpu.core_type<tc>, window_params = [{transform_indices = @transform_0, window_bounds = array<i64: 1, 4, 256>}, {transform_indices = @transform_1, window_bounds = array<i64: 1, 4, 256>}, {pipeline_mode = #tpu.pipeline_mode<synchronous>, transform_indices = @transform_2, window_bounds = array<i64: 9, 1, 256>}, {pipeline_mode = #tpu.pipeline_mode<synchronous>, transform_indices = @transform_3, window_bounds = array<i64: 18, 4, 4>}, {pipeline_mode = #tpu.pipeline_mode<synchronous>, transform_indices = @transform_4, window_bounds = array<i64: 2, 4, 1>}, {pipeline_mode = #tpu.pipeline_mode<synchronous>, transform_indices = @transform_5, window_bounds = array<i64: 4, 4, 4>}, {pipeline_mode = #tpu.pipeline_mode<synchronous>, transform_indices = @transform_6, window_bounds = array<i64: 4, 4, 1>}, {transform_indices = @transform_7, window_bounds = array<i64: 1, 4, 256>}]} {
    %c0 = arith.constant 0 : index
    %c0_0 = arith.constant 0 : index
    %c0_1 = arith.constant 0 : index
    %0 = vector.load %arg1[%c0, %c0_0, %c0_1] : memref<1x4x256xf32, #tpu.memory_space<vmem>>, vector<1x4x256xf32>
    %1 = vector.shape_cast %0 : vector<1x4x256xf32> to vector<4x256xf32>
    %c51_i32 = arith.constant 51 : i32
    %2 = tpu.dynamic_rotate %1 by %c51_i32 dim 1 : vector<4x256xf32>, i32 -> vector<4x256xf32>
    %c0_2 = arith.constant 0 : index
    %c0_3 = arith.constant 0 : index
    %c0_4 = arith.constant 0 : index
    %3 = vector.load %arg3[%c0_2, %c0_3, %c0_4] : memref<9x1x256xf32, #tpu.memory_space<vmem>>, vector<1x1x256xf32>
    %4 = vector.shape_cast %3 : vector<1x1x256xf32> to vector<1x256xf32>
    %5 = vector.broadcast %4 : vector<1x256xf32> to vector<4x256xf32>
    %6 = arith.mulf %2, %5 : vector<4x256xf32>
    %c0_5 = arith.constant 0 : index
    %c0_6 = arith.constant 0 : index
    %c0_7 = arith.constant 0 : index
    %7 = vector.load %arg4[%c0_5, %c0_6, %c0_7] : memref<18x4x4xf32, #tpu.memory_space<vmem>>, vector<1x4x4xf32>
    %8 = vector.shape_cast %7 : vector<1x4x4xf32> to vector<4x4xf32>
    %cst = arith.constant dense<0.000000e+00> : vector<4x256xf32>
    %9 = tpu.matmul %8, %6, %cst {dimension_numbers = #tpu.dot_dimension_numbers<[1], [0], [0], [1], [0, 0, 1, 1], [], []>} : vector<4x4xf32>, vector<4x256xf32>, vector<4x256xf32> -> vector<4x256xf32>
    %c48_i32 = arith.constant 48 : i32
    %10 = tpu.dynamic_rotate %1 by %c48_i32 dim 1 : vector<4x256xf32>, i32 -> vector<4x256xf32>
    %c1 = arith.constant 1 : index
    %c0_8 = arith.constant 0 : index
    %c0_9 = arith.constant 0 : index
    %11 = vector.load %arg3[%c1, %c0_8, %c0_9] : memref<9x1x256xf32, #tpu.memory_space<vmem>>, vector<1x1x256xf32>
    %12 = vector.shape_cast %11 : vector<1x1x256xf32> to vector<1x256xf32>
    %13 = vector.broadcast %12 : vector<1x256xf32> to vector<4x256xf32>
    %14 = arith.mulf %10, %13 : vector<4x256xf32>
    %c1_10 = arith.constant 1 : index
    %c0_11 = arith.constant 0 : index
    %c0_12 = arith.constant 0 : index
    %15 = vector.load %arg4[%c1_10, %c0_11, %c0_12] : memref<18x4x4xf32, #tpu.memory_space<vmem>>, vector<1x4x4xf32>
    %16 = vector.shape_cast %15 : vector<1x4x4xf32> to vector<4x4xf32>
    %cst_13 = arith.constant dense<0.000000e+00> : vector<4x256xf32>
    %17 = tpu.matmul %16, %14, %cst_13 {dimension_numbers = #tpu.dot_dimension_numbers<[1], [0], [0], [1], [0, 0, 1, 1], [], []>} : vector<4x4xf32>, vector<4x256xf32>, vector<4x256xf32> -> vector<4x256xf32>
    %18 = arith.addf %9, %17 : vector<4x256xf32>
    %c45_i32 = arith.constant 45 : i32
    %19 = tpu.dynamic_rotate %1 by %c45_i32 dim 1 : vector<4x256xf32>, i32 -> vector<4x256xf32>
    %c2 = arith.constant 2 : index
    %c0_14 = arith.constant 0 : index
    %c0_15 = arith.constant 0 : index
    %20 = vector.load %arg3[%c2, %c0_14, %c0_15] : memref<9x1x256xf32, #tpu.memory_space<vmem>>, vector<1x1x256xf32>
    %21 = vector.shape_cast %20 : vector<1x1x256xf32> to vector<1x256xf32>
    %22 = vector.broadcast %21 : vector<1x256xf32> to vector<4x256xf32>
    %23 = arith.mulf %19, %22 : vector<4x256xf32>
    %c2_16 = arith.constant 2 : index
    %c0_17 = arith.constant 0 : index
    %c0_18 = arith.constant 0 : index
    %24 = vector.load %arg4[%c2_16, %c0_17, %c0_18] : memref<18x4x4xf32, #tpu.memory_space<vmem>>, vector<1x4x4xf32>
    %25 = vector.shape_cast %24 : vector<1x4x4xf32> to vector<4x4xf32>
    %cst_19 = arith.constant dense<0.000000e+00> : vector<4x256xf32>
    %26 = tpu.matmul %25, %23, %cst_19 {dimension_numbers = #tpu.dot_dimension_numbers<[1], [0], [0], [1], [0, 0, 1, 1], [], []>} : vector<4x4xf32>, vector<4x256xf32>, vector<4x256xf32> -> vector<4x256xf32>
    %27 = arith.addf %18, %26 : vector<4x256xf32>
    %c3_i32 = arith.constant 3 : i32
    %28 = tpu.dynamic_rotate %1 by %c3_i32 dim 1 : vector<4x256xf32>, i32 -> vector<4x256xf32>
    %c3 = arith.constant 3 : index
    %c0_20 = arith.constant 0 : index
    %c0_21 = arith.constant 0 : index
    %29 = vector.load %arg3[%c3, %c0_20, %c0_21] : memref<9x1x256xf32, #tpu.memory_space<vmem>>, vector<1x1x256xf32>
    %30 = vector.shape_cast %29 : vector<1x1x256xf32> to vector<1x256xf32>
    %31 = vector.broadcast %30 : vector<1x256xf32> to vector<4x256xf32>
    %32 = arith.mulf %28, %31 : vector<4x256xf32>
    %c3_22 = arith.constant 3 : index
    %c0_23 = arith.constant 0 : index
    %c0_24 = arith.constant 0 : index
    %33 = vector.load %arg4[%c3_22, %c0_23, %c0_24] : memref<18x4x4xf32, #tpu.memory_space<vmem>>, vector<1x4x4xf32>
    %34 = vector.shape_cast %33 : vector<1x4x4xf32> to vector<4x4xf32>
    %cst_25 = arith.constant dense<0.000000e+00> : vector<4x256xf32>
    %35 = tpu.matmul %34, %32, %cst_25 {dimension_numbers = #tpu.dot_dimension_numbers<[1], [0], [0], [1], [0, 0, 1, 1], [], []>} : vector<4x4xf32>, vector<4x256xf32>, vector<4x256xf32> -> vector<4x256xf32>
    %36 = arith.addf %27, %35 : vector<4x256xf32>
    %c4 = arith.constant 4 : index
    %c0_26 = arith.constant 0 : index
    %c0_27 = arith.constant 0 : index
    %37 = vector.load %arg4[%c4, %c0_26, %c0_27] : memref<18x4x4xf32, #tpu.memory_space<vmem>>, vector<1x4x4xf32>
    %38 = vector.shape_cast %37 : vector<1x4x4xf32> to vector<4x4xf32>
    %cst_28 = arith.constant dense<0.000000e+00> : vector<4x256xf32>
    %39 = tpu.matmul %38, %1, %cst_28 {dimension_numbers = #tpu.dot_dimension_numbers<[1], [0], [0], [1], [0, 0, 1, 1], [], []>} : vector<4x4xf32>, vector<4x256xf32>, vector<4x256xf32> -> vector<4x256xf32>
    %40 = arith.addf %36, %39 : vector<4x256xf32>
    %c253_i32 = arith.constant 253 : i32
    %41 = tpu.dynamic_rotate %1 by %c253_i32 dim 1 : vector<4x256xf32>, i32 -> vector<4x256xf32>
    %c5 = arith.constant 5 : index
    %c0_29 = arith.constant 0 : index
    %c0_30 = arith.constant 0 : index
    %42 = vector.load %arg3[%c5, %c0_29, %c0_30] : memref<9x1x256xf32, #tpu.memory_space<vmem>>, vector<1x1x256xf32>
    %43 = vector.shape_cast %42 : vector<1x1x256xf32> to vector<1x256xf32>
    %44 = vector.broadcast %43 : vector<1x256xf32> to vector<4x256xf32>
    %45 = arith.mulf %41, %44 : vector<4x256xf32>
    %c5_31 = arith.constant 5 : index
    %c0_32 = arith.constant 0 : index
    %c0_33 = arith.constant 0 : index
    %46 = vector.load %arg4[%c5_31, %c0_32, %c0_33] : memref<18x4x4xf32, #tpu.memory_space<vmem>>, vector<1x4x4xf32>
    %47 = vector.shape_cast %46 : vector<1x4x4xf32> to vector<4x4xf32>
    %cst_34 = arith.constant dense<0.000000e+00> : vector<4x256xf32>
    %48 = tpu.matmul %47, %45, %cst_34 {dimension_numbers = #tpu.dot_dimension_numbers<[1], [0], [0], [1], [0, 0, 1, 1], [], []>} : vector<4x4xf32>, vector<4x256xf32>, vector<4x256xf32> -> vector<4x256xf32>
    %49 = arith.addf %40, %48 : vector<4x256xf32>
    %c211_i32 = arith.constant 211 : i32
    %50 = tpu.dynamic_rotate %1 by %c211_i32 dim 1 : vector<4x256xf32>, i32 -> vector<4x256xf32>
    %c6 = arith.constant 6 : index
    %c0_35 = arith.constant 0 : index
    %c0_36 = arith.constant 0 : index
    %51 = vector.load %arg3[%c6, %c0_35, %c0_36] : memref<9x1x256xf32, #tpu.memory_space<vmem>>, vector<1x1x256xf32>
    %52 = vector.shape_cast %51 : vector<1x1x256xf32> to vector<1x256xf32>
    %53 = vector.broadcast %52 : vector<1x256xf32> to vector<4x256xf32>
    %54 = arith.mulf %50, %53 : vector<4x256xf32>
    %c6_37 = arith.constant 6 : index
    %c0_38 = arith.constant 0 : index
    %c0_39 = arith.constant 0 : index
    %55 = vector.load %arg4[%c6_37, %c0_38, %c0_39] : memref<18x4x4xf32, #tpu.memory_space<vmem>>, vector<1x4x4xf32>
    %56 = vector.shape_cast %55 : vector<1x4x4xf32> to vector<4x4xf32>
    %cst_40 = arith.constant dense<0.000000e+00> : vector<4x256xf32>
    %57 = tpu.matmul %56, %54, %cst_40 {dimension_numbers = #tpu.dot_dimension_numbers<[1], [0], [0], [1], [0, 0, 1, 1], [], []>} : vector<4x4xf32>, vector<4x256xf32>, vector<4x256xf32> -> vector<4x256xf32>
    %58 = arith.addf %49, %57 : vector<4x256xf32>
    %c208_i32 = arith.constant 208 : i32
    %59 = tpu.dynamic_rotate %1 by %c208_i32 dim 1 : vector<4x256xf32>, i32 -> vector<4x256xf32>
    %c7 = arith.constant 7 : index
    %c0_41 = arith.constant 0 : index
    %c0_42 = arith.constant 0 : index
    %60 = vector.load %arg3[%c7, %c0_41, %c0_42] : memref<9x1x256xf32, #tpu.memory_space<vmem>>, vector<1x1x256xf32>
    %61 = vector.shape_cast %60 : vector<1x1x256xf32> to vector<1x256xf32>
    %62 = vector.broadcast %61 : vector<1x256xf32> to vector<4x256xf32>
    %63 = arith.mulf %59, %62 : vector<4x256xf32>
    %c7_43 = arith.constant 7 : index
    %c0_44 = arith.constant 0 : index
    %c0_45 = arith.constant 0 : index
    %64 = vector.load %arg4[%c7_43, %c0_44, %c0_45] : memref<18x4x4xf32, #tpu.memory_space<vmem>>, vector<1x4x4xf32>
    %65 = vector.shape_cast %64 : vector<1x4x4xf32> to vector<4x4xf32>
    %cst_46 = arith.constant dense<0.000000e+00> : vector<4x256xf32>
    %66 = tpu.matmul %65, %63, %cst_46 {dimension_numbers = #tpu.dot_dimension_numbers<[1], [0], [0], [1], [0, 0, 1, 1], [], []>} : vector<4x4xf32>, vector<4x256xf32>, vector<4x256xf32> -> vector<4x256xf32>
    %67 = arith.addf %58, %66 : vector<4x256xf32>
    %c205_i32 = arith.constant 205 : i32
    %68 = tpu.dynamic_rotate %1 by %c205_i32 dim 1 : vector<4x256xf32>, i32 -> vector<4x256xf32>
    %c8 = arith.constant 8 : index
    %c0_47 = arith.constant 0 : index
    %c0_48 = arith.constant 0 : index
    %69 = vector.load %arg3[%c8, %c0_47, %c0_48] : memref<9x1x256xf32, #tpu.memory_space<vmem>>, vector<1x1x256xf32>
    %70 = vector.shape_cast %69 : vector<1x1x256xf32> to vector<1x256xf32>
    %71 = vector.broadcast %70 : vector<1x256xf32> to vector<4x256xf32>
    %72 = arith.mulf %68, %71 : vector<4x256xf32>
    %c8_49 = arith.constant 8 : index
    %c0_50 = arith.constant 0 : index
    %c0_51 = arith.constant 0 : index
    %73 = vector.load %arg4[%c8_49, %c0_50, %c0_51] : memref<18x4x4xf32, #tpu.memory_space<vmem>>, vector<1x4x4xf32>
    %74 = vector.shape_cast %73 : vector<1x4x4xf32> to vector<4x4xf32>
    %cst_52 = arith.constant dense<0.000000e+00> : vector<4x256xf32>
    %75 = tpu.matmul %74, %72, %cst_52 {dimension_numbers = #tpu.dot_dimension_numbers<[1], [0], [0], [1], [0, 0, 1, 1], [], []>} : vector<4x4xf32>, vector<4x256xf32>, vector<4x256xf32> -> vector<4x256xf32>
    %76 = arith.addf %67, %75 : vector<4x256xf32>
    %c0_53 = arith.constant 0 : index
    %c0_54 = arith.constant 0 : index
    %c0_55 = arith.constant 0 : index
    %77 = vector.load %arg5[%c0_53, %c0_54, %c0_55] : memref<2x4x1xf32, #tpu.memory_space<vmem>>, vector<1x4x1xf32>
    %78 = vector.shape_cast %77 : vector<1x4x1xf32> to vector<4x1xf32>
    %79 = vector.broadcast %78 : vector<4x1xf32> to vector<4x256xf32>
    %80 = arith.addf %76, %79 : vector<4x256xf32>
    %cst_56 = arith.constant 0.000000e+00 : f32
    %81 = vector.broadcast %cst_56 : f32 to vector<4x256xf32>
    %82 = arith.maximumf %80, %81 : vector<4x256xf32>
    %cst_57 = arith.constant dense<0.000000e+00> : vector<4xf32>
    %83 = vector.multi_reduction <add>, %82, %cst_57 [1] : vector<4x256xf32> to vector<4xf32>
    %84 = vector.shape_cast %83 : vector<4xf32> to vector<4x1xf32>
    %cst_58 = arith.constant 2.560000e+02 : f32
    %85 = vector.broadcast %cst_58 : f32 to vector<4x1xf32>
    %86 = arith.divf %84, %85 : vector<4x1xf32>
    %c0_59 = arith.constant 0 : index
    %c0_60 = arith.constant 0 : index
    %c0_61 = arith.constant 0 : index
    %87 = vector.load %arg2[%c0_59, %c0_60, %c0_61] : memref<1x4x256xf32, #tpu.memory_space<vmem>>, vector<1x4x256xf32>
    %88 = vector.shape_cast %87 : vector<1x4x256xf32> to vector<4x256xf32>
    %c51_i32_62 = arith.constant 51 : i32
    %89 = tpu.dynamic_rotate %88 by %c51_i32_62 dim 1 : vector<4x256xf32>, i32 -> vector<4x256xf32>
    %c0_63 = arith.constant 0 : index
    %c0_64 = arith.constant 0 : index
    %c0_65 = arith.constant 0 : index
    %90 = vector.load %arg3[%c0_63, %c0_64, %c0_65] : memref<9x1x256xf32, #tpu.memory_space<vmem>>, vector<1x1x256xf32>
    %91 = vector.shape_cast %90 : vector<1x1x256xf32> to vector<1x256xf32>
    %92 = vector.broadcast %91 : vector<1x256xf32> to vector<4x256xf32>
    %93 = arith.mulf %89, %92 : vector<4x256xf32>
    %c9 = arith.constant 9 : index
    %c0_66 = arith.constant 0 : index
    %c0_67 = arith.constant 0 : index
    %94 = vector.load %arg4[%c9, %c0_66, %c0_67] : memref<18x4x4xf32, #tpu.memory_space<vmem>>, vector<1x4x4xf32>
    %95 = vector.shape_cast %94 : vector<1x4x4xf32> to vector<4x4xf32>
    %cst_68 = arith.constant dense<0.000000e+00> : vector<4x256xf32>
    %96 = tpu.matmul %95, %93, %cst_68 {dimension_numbers = #tpu.dot_dimension_numbers<[1], [0], [0], [1], [0, 0, 1, 1], [], []>} : vector<4x4xf32>, vector<4x256xf32>, vector<4x256xf32> -> vector<4x256xf32>
    %c48_i32_69 = arith.constant 48 : i32
    %97 = tpu.dynamic_rotate %88 by %c48_i32_69 dim 1 : vector<4x256xf32>, i32 -> vector<4x256xf32>
    %c1_70 = arith.constant 1 : index
    %c0_71 = arith.constant 0 : index
    %c0_72 = arith.constant 0 : index
    %98 = vector.load %arg3[%c1_70, %c0_71, %c0_72] : memref<9x1x256xf32, #tpu.memory_space<vmem>>, vector<1x1x256xf32>
    %99 = vector.shape_cast %98 : vector<1x1x256xf32> to vector<1x256xf32>
    %100 = vector.broadcast %99 : vector<1x256xf32> to vector<4x256xf32>
    %101 = arith.mulf %97, %100 : vector<4x256xf32>
    %c10 = arith.constant 10 : index
    %c0_73 = arith.constant 0 : index
    %c0_74 = arith.constant 0 : index
    %102 = vector.load %arg4[%c10, %c0_73, %c0_74] : memref<18x4x4xf32, #tpu.memory_space<vmem>>, vector<1x4x4xf32>
    %103 = vector.shape_cast %102 : vector<1x4x4xf32> to vector<4x4xf32>
    %cst_75 = arith.constant dense<0.000000e+00> : vector<4x256xf32>
    %104 = tpu.matmul %103, %101, %cst_75 {dimension_numbers = #tpu.dot_dimension_numbers<[1], [0], [0], [1], [0, 0, 1, 1], [], []>} : vector<4x4xf32>, vector<4x256xf32>, vector<4x256xf32> -> vector<4x256xf32>
    %105 = arith.addf %96, %104 : vector<4x256xf32>
    %c45_i32_76 = arith.constant 45 : i32
    %106 = tpu.dynamic_rotate %88 by %c45_i32_76 dim 1 : vector<4x256xf32>, i32 -> vector<4x256xf32>
    %c2_77 = arith.constant 2 : index
    %c0_78 = arith.constant 0 : index
    %c0_79 = arith.constant 0 : index
    %107 = vector.load %arg3[%c2_77, %c0_78, %c0_79] : memref<9x1x256xf32, #tpu.memory_space<vmem>>, vector<1x1x256xf32>
    %108 = vector.shape_cast %107 : vector<1x1x256xf32> to vector<1x256xf32>
    %109 = vector.broadcast %108 : vector<1x256xf32> to vector<4x256xf32>
    %110 = arith.mulf %106, %109 : vector<4x256xf32>
    %c11 = arith.constant 11 : index
    %c0_80 = arith.constant 0 : index
    %c0_81 = arith.constant 0 : index
    %111 = vector.load %arg4[%c11, %c0_80, %c0_81] : memref<18x4x4xf32, #tpu.memory_space<vmem>>, vector<1x4x4xf32>
    %112 = vector.shape_cast %111 : vector<1x4x4xf32> to vector<4x4xf32>
    %cst_82 = arith.constant dense<0.000000e+00> : vector<4x256xf32>
    %113 = tpu.matmul %112, %110, %cst_82 {dimension_numbers = #tpu.dot_dimension_numbers<[1], [0], [0], [1], [0, 0, 1, 1], [], []>} : vector<4x4xf32>, vector<4x256xf32>, vector<4x256xf32> -> vector<4x256xf32>
    %114 = arith.addf %105, %113 : vector<4x256xf32>
    %c3_i32_83 = arith.constant 3 : i32
    %115 = tpu.dynamic_rotate %88 by %c3_i32_83 dim 1 : vector<4x256xf32>, i32 -> vector<4x256xf32>
    %c3_84 = arith.constant 3 : index
    %c0_85 = arith.constant 0 : index
    %c0_86 = arith.constant 0 : index
    %116 = vector.load %arg3[%c3_84, %c0_85, %c0_86] : memref<9x1x256xf32, #tpu.memory_space<vmem>>, vector<1x1x256xf32>
    %117 = vector.shape_cast %116 : vector<1x1x256xf32> to vector<1x256xf32>
    %118 = vector.broadcast %117 : vector<1x256xf32> to vector<4x256xf32>
    %119 = arith.mulf %115, %118 : vector<4x256xf32>
    %c12 = arith.constant 12 : index
    %c0_87 = arith.constant 0 : index
    %c0_88 = arith.constant 0 : index
    %120 = vector.load %arg4[%c12, %c0_87, %c0_88] : memref<18x4x4xf32, #tpu.memory_space<vmem>>, vector<1x4x4xf32>
    %121 = vector.shape_cast %120 : vector<1x4x4xf32> to vector<4x4xf32>
    %cst_89 = arith.constant dense<0.000000e+00> : vector<4x256xf32>
    %122 = tpu.matmul %121, %119, %cst_89 {dimension_numbers = #tpu.dot_dimension_numbers<[1], [0], [0], [1], [0, 0, 1, 1], [], []>} : vector<4x4xf32>, vector<4x256xf32>, vector<4x256xf32> -> vector<4x256xf32>
    %123 = arith.addf %114, %122 : vector<4x256xf32>
    %c13 = arith.constant 13 : index
    %c0_90 = arith.constant 0 : index
    %c0_91 = arith.constant 0 : index
    %124 = vector.load %arg4[%c13, %c0_90, %c0_91] : memref<18x4x4xf32, #tpu.memory_space<vmem>>, vector<1x4x4xf32>
    %125 = vector.shape_cast %124 : vector<1x4x4xf32> to vector<4x4xf32>
    %cst_92 = arith.constant dense<0.000000e+00> : vector<4x256xf32>
    %126 = tpu.matmul %125, %88, %cst_92 {dimension_numbers = #tpu.dot_dimension_numbers<[1], [0], [0], [1], [0, 0, 1, 1], [], []>} : vector<4x4xf32>, vector<4x256xf32>, vector<4x256xf32> -> vector<4x256xf32>
    %127 = arith.addf %123, %126 : vector<4x256xf32>
    %c253_i32_93 = arith.constant 253 : i32
    %128 = tpu.dynamic_rotate %88 by %c253_i32_93 dim 1 : vector<4x256xf32>, i32 -> vector<4x256xf32>
    %c5_94 = arith.constant 5 : index
    %c0_95 = arith.constant 0 : index
    %c0_96 = arith.constant 0 : index
    %129 = vector.load %arg3[%c5_94, %c0_95, %c0_96] : memref<9x1x256xf32, #tpu.memory_space<vmem>>, vector<1x1x256xf32>
    %130 = vector.shape_cast %129 : vector<1x1x256xf32> to vector<1x256xf32>
    %131 = vector.broadcast %130 : vector<1x256xf32> to vector<4x256xf32>
    %132 = arith.mulf %128, %131 : vector<4x256xf32>
    %c14 = arith.constant 14 : index
    %c0_97 = arith.constant 0 : index
    %c0_98 = arith.constant 0 : index
    %133 = vector.load %arg4[%c14, %c0_97, %c0_98] : memref<18x4x4xf32, #tpu.memory_space<vmem>>, vector<1x4x4xf32>
    %134 = vector.shape_cast %133 : vector<1x4x4xf32> to vector<4x4xf32>
    %cst_99 = arith.constant dense<0.000000e+00> : vector<4x256xf32>
    %135 = tpu.matmul %134, %132, %cst_99 {dimension_numbers = #tpu.dot_dimension_numbers<[1], [0], [0], [1], [0, 0, 1, 1], [], []>} : vector<4x4xf32>, vector<4x256xf32>, vector<4x256xf32> -> vector<4x256xf32>
    %136 = arith.addf %127, %135 : vector<4x256xf32>
    %c211_i32_100 = arith.constant 211 : i32
    %137 = tpu.dynamic_rotate %88 by %c211_i32_100 dim 1 : vector<4x256xf32>, i32 -> vector<4x256xf32>
    %c6_101 = arith.constant 6 : index
    %c0_102 = arith.constant 0 : index
    %c0_103 = arith.constant 0 : index
    %138 = vector.load %arg3[%c6_101, %c0_102, %c0_103] : memref<9x1x256xf32, #tpu.memory_space<vmem>>, vector<1x1x256xf32>
    %139 = vector.shape_cast %138 : vector<1x1x256xf32> to vector<1x256xf32>
    %140 = vector.broadcast %139 : vector<1x256xf32> to vector<4x256xf32>
    %141 = arith.mulf %137, %140 : vector<4x256xf32>
    %c15 = arith.constant 15 : index
    %c0_104 = arith.constant 0 : index
    %c0_105 = arith.constant 0 : index
    %142 = vector.load %arg4[%c15, %c0_104, %c0_105] : memref<18x4x4xf32, #tpu.memory_space<vmem>>, vector<1x4x4xf32>
    %143 = vector.shape_cast %142 : vector<1x4x4xf32> to vector<4x4xf32>
    %cst_106 = arith.constant dense<0.000000e+00> : vector<4x256xf32>
    %144 = tpu.matmul %143, %141, %cst_106 {dimension_numbers = #tpu.dot_dimension_numbers<[1], [0], [0], [1], [0, 0, 1, 1], [], []>} : vector<4x4xf32>, vector<4x256xf32>, vector<4x256xf32> -> vector<4x256xf32>
    %145 = arith.addf %136, %144 : vector<4x256xf32>
    %c208_i32_107 = arith.constant 208 : i32
    %146 = tpu.dynamic_rotate %88 by %c208_i32_107 dim 1 : vector<4x256xf32>, i32 -> vector<4x256xf32>
    %c7_108 = arith.constant 7 : index
    %c0_109 = arith.constant 0 : index
    %c0_110 = arith.constant 0 : index
    %147 = vector.load %arg3[%c7_108, %c0_109, %c0_110] : memref<9x1x256xf32, #tpu.memory_space<vmem>>, vector<1x1x256xf32>
    %148 = vector.shape_cast %147 : vector<1x1x256xf32> to vector<1x256xf32>
    %149 = vector.broadcast %148 : vector<1x256xf32> to vector<4x256xf32>
    %150 = arith.mulf %146, %149 : vector<4x256xf32>
    %c16 = arith.constant 16 : index
    %c0_111 = arith.constant 0 : index
    %c0_112 = arith.constant 0 : index
    %151 = vector.load %arg4[%c16, %c0_111, %c0_112] : memref<18x4x4xf32, #tpu.memory_space<vmem>>, vector<1x4x4xf32>
    %152 = vector.shape_cast %151 : vector<1x4x4xf32> to vector<4x4xf32>
    %cst_113 = arith.constant dense<0.000000e+00> : vector<4x256xf32>
    %153 = tpu.matmul %152, %150, %cst_113 {dimension_numbers = #tpu.dot_dimension_numbers<[1], [0], [0], [1], [0, 0, 1, 1], [], []>} : vector<4x4xf32>, vector<4x256xf32>, vector<4x256xf32> -> vector<4x256xf32>
    %154 = arith.addf %145, %153 : vector<4x256xf32>
    %c205_i32_114 = arith.constant 205 : i32
    %155 = tpu.dynamic_rotate %88 by %c205_i32_114 dim 1 : vector<4x256xf32>, i32 -> vector<4x256xf32>
    %c8_115 = arith.constant 8 : index
    %c0_116 = arith.constant 0 : index
    %c0_117 = arith.constant 0 : index
    %156 = vector.load %arg3[%c8_115, %c0_116, %c0_117] : memref<9x1x256xf32, #tpu.memory_space<vmem>>, vector<1x1x256xf32>
    %157 = vector.shape_cast %156 : vector<1x1x256xf32> to vector<1x256xf32>
    %158 = vector.broadcast %157 : vector<1x256xf32> to vector<4x256xf32>
    %159 = arith.mulf %155, %158 : vector<4x256xf32>
    %c17 = arith.constant 17 : index
    %c0_118 = arith.constant 0 : index
    %c0_119 = arith.constant 0 : index
    %160 = vector.load %arg4[%c17, %c0_118, %c0_119] : memref<18x4x4xf32, #tpu.memory_space<vmem>>, vector<1x4x4xf32>
    %161 = vector.shape_cast %160 : vector<1x4x4xf32> to vector<4x4xf32>
    %cst_120 = arith.constant dense<0.000000e+00> : vector<4x256xf32>
    %162 = tpu.matmul %161, %159, %cst_120 {dimension_numbers = #tpu.dot_dimension_numbers<[1], [0], [0], [1], [0, 0, 1, 1], [], []>} : vector<4x4xf32>, vector<4x256xf32>, vector<4x256xf32> -> vector<4x256xf32>
    %163 = arith.addf %154, %162 : vector<4x256xf32>
    %c1_121 = arith.constant 1 : index
    %c0_122 = arith.constant 0 : index
    %c0_123 = arith.constant 0 : index
    %164 = vector.load %arg5[%c1_121, %c0_122, %c0_123] : memref<2x4x1xf32, #tpu.memory_space<vmem>>, vector<1x4x1xf32>
    %165 = vector.shape_cast %164 : vector<1x4x1xf32> to vector<4x1xf32>
    %166 = vector.broadcast %165 : vector<4x1xf32> to vector<4x256xf32>
    %167 = arith.addf %163, %166 : vector<4x256xf32>
    %cst_124 = arith.constant 0.000000e+00 : f32
    %168 = vector.broadcast %cst_124 : f32 to vector<4x256xf32>
    %169 = arith.maximumf %167, %168 : vector<4x256xf32>
    %cst_125 = arith.constant dense<0.000000e+00> : vector<4xf32>
    %170 = vector.multi_reduction <add>, %169, %cst_125 [1] : vector<4x256xf32> to vector<4xf32>
    %171 = vector.shape_cast %170 : vector<4xf32> to vector<4x1xf32>
    %cst_126 = arith.constant 2.560000e+02 : f32
    %172 = vector.broadcast %cst_126 : f32 to vector<4x1xf32>
    %173 = arith.divf %171, %172 : vector<4x1xf32>
    %c0_127 = arith.constant 0 : index
    %c0_128 = arith.constant 0 : index
    %c0_129 = arith.constant 0 : index
    %174 = vector.load %arg6[%c0_127, %c0_128, %c0_129] : memref<4x4x4xf32, #tpu.memory_space<vmem>>, vector<1x4x4xf32>
    %175 = vector.shape_cast %174 : vector<1x4x4xf32> to vector<4x4xf32>
    %cst_130 = arith.constant dense<0.000000e+00> : vector<4x1xf32>
    %176 = tpu.matmul %175, %86, %cst_130 {dimension_numbers = #tpu.dot_dimension_numbers<[1], [0], [0], [1], [0, 0, 1, 1], [], []>} : vector<4x4xf32>, vector<4x1xf32>, vector<4x1xf32> -> vector<4x1xf32>
    %c0_131 = arith.constant 0 : index
    %c0_132 = arith.constant 0 : index
    %c0_133 = arith.constant 0 : index
    %177 = vector.load %arg7[%c0_131, %c0_132, %c0_133] : memref<4x4x1xf32, #tpu.memory_space<vmem>>, vector<1x4x1xf32>
    %178 = vector.shape_cast %177 : vector<1x4x1xf32> to vector<4x1xf32>
    %179 = arith.addf %176, %178 : vector<4x1xf32>
    %cst_134 = arith.constant 0.000000e+00 : f32
    %180 = vector.broadcast %cst_134 : f32 to vector<4x1xf32>
    %181 = arith.maximumf %179, %180 : vector<4x1xf32>
    %c1_135 = arith.constant 1 : index
    %c0_136 = arith.constant 0 : index
    %c0_137 = arith.constant 0 : index
    %182 = vector.load %arg6[%c1_135, %c0_136, %c0_137] : memref<4x4x4xf32, #tpu.memory_space<vmem>>, vector<1x4x4xf32>
    %183 = vector.shape_cast %182 : vector<1x4x4xf32> to vector<4x4xf32>
    %cst_138 = arith.constant dense<0.000000e+00> : vector<4x1xf32>
    %184 = tpu.matmul %183, %173, %cst_138 {dimension_numbers = #tpu.dot_dimension_numbers<[1], [0], [0], [1], [0, 0, 1, 1], [], []>} : vector<4x4xf32>, vector<4x1xf32>, vector<4x1xf32> -> vector<4x1xf32>
    %c1_139 = arith.constant 1 : index
    %c0_140 = arith.constant 0 : index
    %c0_141 = arith.constant 0 : index
    %185 = vector.load %arg7[%c1_139, %c0_140, %c0_141] : memref<4x4x1xf32, #tpu.memory_space<vmem>>, vector<1x4x1xf32>
    %186 = vector.shape_cast %185 : vector<1x4x1xf32> to vector<4x1xf32>
    %187 = arith.addf %184, %186 : vector<4x1xf32>
    %cst_142 = arith.constant 0.000000e+00 : f32
    %188 = vector.broadcast %cst_142 : f32 to vector<4x1xf32>
    %189 = arith.maximumf %187, %188 : vector<4x1xf32>
    %c2_143 = arith.constant 2 : index
    %c0_144 = arith.constant 0 : index
    %c0_145 = arith.constant 0 : index
    %190 = vector.load %arg6[%c2_143, %c0_144, %c0_145] : memref<4x4x4xf32, #tpu.memory_space<vmem>>, vector<1x4x4xf32>
    %191 = vector.shape_cast %190 : vector<1x4x4xf32> to vector<4x4xf32>
    %cst_146 = arith.constant dense<0.000000e+00> : vector<4x1xf32>
    %192 = tpu.matmul %191, %181, %cst_146 {dimension_numbers = #tpu.dot_dimension_numbers<[1], [0], [0], [1], [0, 0, 1, 1], [], []>} : vector<4x4xf32>, vector<4x1xf32>, vector<4x1xf32> -> vector<4x1xf32>
    %c2_147 = arith.constant 2 : index
    %c0_148 = arith.constant 0 : index
    %c0_149 = arith.constant 0 : index
    %193 = vector.load %arg7[%c2_147, %c0_148, %c0_149] : memref<4x4x1xf32, #tpu.memory_space<vmem>>, vector<1x4x1xf32>
    %194 = vector.shape_cast %193 : vector<1x4x1xf32> to vector<4x1xf32>
    %195 = arith.addf %192, %194 : vector<4x1xf32>
    %cst_150 = arith.constant 0.000000e+00 : f32
    %196 = vector.broadcast %cst_150 : f32 to vector<4x1xf32>
    %197 = arith.maximumf %195, %196 : vector<4x1xf32>
    %c3_151 = arith.constant 3 : index
    %c0_152 = arith.constant 0 : index
    %c0_153 = arith.constant 0 : index
    %198 = vector.load %arg6[%c3_151, %c0_152, %c0_153] : memref<4x4x4xf32, #tpu.memory_space<vmem>>, vector<1x4x4xf32>
    %199 = vector.shape_cast %198 : vector<1x4x4xf32> to vector<4x4xf32>
    %cst_154 = arith.constant dense<0.000000e+00> : vector<4x1xf32>
    %200 = tpu.matmul %199, %189, %cst_154 {dimension_numbers = #tpu.dot_dimension_numbers<[1], [0], [0], [1], [0, 0, 1, 1], [], []>} : vector<4x4xf32>, vector<4x1xf32>, vector<4x1xf32> -> vector<4x1xf32>
    %c3_155 = arith.constant 3 : index
    %c0_156 = arith.constant 0 : index
    %c0_157 = arith.constant 0 : index
    %201 = vector.load %arg7[%c3_155, %c0_156, %c0_157] : memref<4x4x1xf32, #tpu.memory_space<vmem>>, vector<1x4x1xf32>
    %202 = vector.shape_cast %201 : vector<1x4x1xf32> to vector<4x1xf32>
    %203 = arith.addf %200, %202 : vector<4x1xf32>
    %cst_158 = arith.constant 0.000000e+00 : f32
    %204 = vector.broadcast %cst_158 : f32 to vector<4x1xf32>
    %205 = arith.maximumf %203, %204 : vector<4x1xf32>
    %cst_159 = arith.constant 0.000000e+00 : f32
    %206 = vector.broadcast %cst_159 : f32 to vector<4x1xf32>
    %207 = arith.subf %206, %205 : vector<4x1xf32>
    %208 = math.exp %207 : vector<4x1xf32>
    %cst_160 = arith.constant 1.000000e+00 : f32
    %209 = vector.broadcast %cst_160 : f32 to vector<4x1xf32>
    %210 = arith.addf %209, %208 : vector<4x1xf32>
    %cst_161 = arith.constant 1.000000e+00 : f32
    %211 = vector.broadcast %cst_161 : f32 to vector<4x1xf32>
    %212 = arith.divf %211, %210 : vector<4x1xf32>
    %cst_162 = arith.constant 2.000000e+00 : f32
    %213 = vector.broadcast %cst_162 : f32 to vector<4x1xf32>
    %214 = arith.mulf %213, %197 : vector<4x1xf32>
    %215 = arith.mulf %214, %212 : vector<4x1xf32>
    %216 = vector.extract_strided_slice %197 {offsets = [0, 0], sizes = [1, 1], strides = [1, 1]} : vector<4x1xf32> to vector<1x1xf32>
    %217 = vector.broadcast %216 : vector<1x1xf32> to vector<4x1xf32>
    %218 = arith.mulf %215, %217 : vector<4x1xf32>
    %219 = vector.extract_strided_slice %212 {offsets = [1, 0], sizes = [1, 1], strides = [1, 1]} : vector<4x1xf32> to vector<1x1xf32>
    %220 = vector.broadcast %219 : vector<1x1xf32> to vector<4x1xf32>
    %221 = arith.mulf %218, %220 : vector<4x1xf32>
    %c0_163 = arith.constant 0 : index
    %c0_164 = arith.constant 0 : index
    %c0_165 = arith.constant 0 : index
    %222 = vector.load %arg1[%c0_163, %c0_164, %c0_165] : memref<1x4x256xf32, #tpu.memory_space<vmem>>, vector<1x4x256xf32>
    %223 = vector.shape_cast %222 : vector<1x4x256xf32> to vector<4x256xf32>
    %c0_166 = arith.constant 0 : index
    %c0_167 = arith.constant 0 : index
    %c0_168 = arith.constant 0 : index
    %224 = vector.load %arg2[%c0_166, %c0_167, %c0_168] : memref<1x4x256xf32, #tpu.memory_space<vmem>>, vector<1x4x256xf32>
    %225 = vector.shape_cast %224 : vector<1x4x256xf32> to vector<4x256xf32>
    %226 = arith.mulf %223, %225 : vector<4x256xf32>
    %227 = vector.broadcast %221 : vector<4x1xf32> to vector<4x256xf32>
    %228 = arith.mulf %226, %227 : vector<4x256xf32>
    %c0_169 = arith.constant 0 : index
    %c0_170 = arith.constant 0 : index
    %c0_171 = arith.constant 0 : index
    %229 = vector.load %arg8[%c0_169, %c0_170, %c0_171] : memref<1x4x256xf32, #tpu.memory_space<vmem>>, vector<1x4x256xf32>
    %230 = vector.shape_cast %229 : vector<1x4x256xf32> to vector<4x256xf32>
    %231 = vector.shape_cast %228 : vector<4x256xf32> to vector<1x4x256xf32>
    tpu.vector_store %arg8[%c0_169, %c0_170, %c0_171], %231 {strides = array<i32>} : memref<1x4x256xf32, #tpu.memory_space<vmem>>, vector<1x4x256xf32>,
    return
  }
  func.func @transform_0(%arg0: i32) -> (i32, i32, i32) {
    %c0_i32 = arith.constant 0 : i32
    %c0_i32_0 = arith.constant 0 : i32
    %c0_i32_1 = arith.constant 0 : i32
    return %arg0, %c0_i32, %c0_i32_0 : i32, i32, i32
  }
  func.func @transform_1(%arg0: i32) -> (i32, i32, i32) {
    %c0_i32 = arith.constant 0 : i32
    %c0_i32_0 = arith.constant 0 : i32
    %c0_i32_1 = arith.constant 0 : i32
    return %arg0, %c0_i32, %c0_i32_0 : i32, i32, i32
  }
  func.func @transform_2(%arg0: i32) -> (i32, i32, i32) {
    %c0_i32 = arith.constant 0 : i32
    %c0_i32_0 = arith.constant 0 : i32
    %c0_i32_1 = arith.constant 0 : i32
    %c0_i32_2 = arith.constant 0 : i32
    return %c0_i32, %c0_i32_0, %c0_i32_1 : i32, i32, i32
  }
  func.func @transform_3(%arg0: i32) -> (i32, i32, i32) {
    %c0_i32 = arith.constant 0 : i32
    %c0_i32_0 = arith.constant 0 : i32
    %c0_i32_1 = arith.constant 0 : i32
    %c0_i32_2 = arith.constant 0 : i32
    return %c0_i32, %c0_i32_0, %c0_i32_1 : i32, i32, i32
  }
  func.func @transform_4(%arg0: i32) -> (i32, i32, i32) {
    %c0_i32 = arith.constant 0 : i32
    %c0_i32_0 = arith.constant 0 : i32
    %c0_i32_1 = arith.constant 0 : i32
    %c0_i32_2 = arith.constant 0 : i32
    return %c0_i32, %c0_i32_0, %c0_i32_1 : i32, i32, i32
  }
  func.func @transform_5(%arg0: i32) -> (i32, i32, i32) {
    %c0_i32 = arith.constant 0 : i32
    %c0_i32_0 = arith.constant 0 : i32
    %c0_i32_1 = arith.constant 0 : i32
    %c0_i32_2 = arith.constant 0 : i32
    return %c0_i32, %c0_i32_0, %c0_i32_1 : i32, i32, i32
  }
  func.func @transform_6(%arg0: i32) -> (i32, i32, i32) {
    %c0_i32 = arith.constant 0 : i32
    %c0_i32_0 = arith.constant 0 : i32
    %c0_i32_1 = arith.constant 0 : i32
    %c0_i32_2 = arith.constant 0 : i32
    return %c0_i32, %c0_i32_0, %c0_i32_1 : i32, i32, i32
  }
  func.func @transform_7(%arg0: i32) -> (i32, i32, i32) {
    %c0_i32 = arith.constant 0 : i32
    %c0_i32_0 = arith.constant 0 : i32
    %c0_i32_1 = arith.constant 0 : i32
    return %arg0, %c0_i32, %c0_i32_0 : i32, i32, i32
  }
}

</mosaic_0001>

<bundles_post_ra>
// kernel: tpu_custom_call.1
= control target key start
LH: loop header
LB: loop body
LE: loop exit
PB: predicated region body
PF: predicated region fallthrough
CT: control target
= control target key end

     0   :  { %12 = vsyncpa [#allocation3], 0  ;;  %s2636_s0 = inlined_call_operand.vmem [shape: f32[2,4,256], index: 0, kind: input, shape index: {}]   ;;  %s2637_s1 = inlined_call_operand.vmem [shape: f32[2,4,256], index: 1, kind: input, shape index: {}]   ;;  %s2638_s2 = inlined_call_operand.vmem [shape: f32[9,1,256], index: 2, kind: input, shape index: {}]   ;;  %s2639_s3 = inlined_call_operand.vmem [shape: f32[18,4,4], index: 3, kind: input, shape index: {}]   ;;  %s2640_s4 = inlined_call_operand.vmem [shape: f32[2,4,1], index: 4, kind: input, shape index: {}]   ;;  %s2641_s5 = inlined_call_operand.vmem [shape: f32[4,4,4], index: 5, kind: input, shape index: {}]   ;;  %s2642_s6 = inlined_call_operand.vmem [shape: f32[4,4,1], index: 6, kind: input, shape index: {}]   ;;  %s2643_s7 = inlined_call_operand.hbm [shape: f32[2,4,256], index: 7, kind: output, shape index: {}]  }
   0x1   :  { %14 = vsyncpa [#allocation3 + $0x1], 0  ;;  %s2111_s24 = smov 0   ;;  %s2113_s25 = smov 0  }
   0x2   :  { %s2115_s26 = smov 0   ;;  %s2117_s27 = smov 0  }
   0x3 LB: > { %s2132_s28 = sadd.s32 4294967295, %s2058_s27   ;;  %s1810_s29 = sadd.s32 4294967294, %s2058_s27   ;;  %s2058_s27 = sphi %s2117_s27, %s2649_s27   ;;  %s2054_s26 = sphi %s2115_s26, %s2648_s26   ;;  %s2050_s25 = sphi %s2113_s25, %s2647_s25   ;;  %s2046_s24 = sphi %s2111_s24, %s2646_s24  }
   0x4   : > { %s2136_s30 = sadd.s32 1, %s2058_s27   ;;  %s184_s8 = sadd.s32 1, %s2054_s26 }
   0x5   : > { %s181_s9 = ssub.s32 %s2058_s27, %s2136_s30  ;;  %p194_p0 = scmp.ne.s32.totalorder %s2054_s26, %s2050_s25 }
   0x6   : > { %p182_p1 = scmp.eq.s32.totalorder %s181_s9, 0  ;;  %p195_p2 = scmp.eq.s32.totalorder %s2132_s28, 1 }
   0x7   : > { %p200_p3 = scmp.ne.s32.totalorder %s2050_s25, %s2046_s24  ;;  %p201_p4 = scmp.eq.s32.totalorder %s1810_s29, 1 }
   0x8   : > { %s2147_s10 = scalar_select %p182_p1, %s2054_s26, %s184_s8  }
   0x9   : > { %p2149_p5 = por %p195_p2, %p194_p0  ;;  %p2153_p6 = por %p201_p4, %p200_p3 }
   0xa   : > { %p1813_p7 = scmp.ge.s32.totalorder %s2058_s27, 1  ;;  %p250_p8 = scmp.lt.s32.totalorder %s2058_s27, 3 }
   0xc   : > { %p251_p9 = pnand %p1813_p7, %p250_p8 }
   0xd   : > { %p287_p10 = scmp.lt.s32.totalorder (!%p251_p9), %s2132_s28, 1  ;;  %s2060_s18 = smov (!%p251_p9), 51  }
   0xe   : > { %254 = sbr.rel (%p251_p9) target bundleno = 976 (0x3d0), region = 48  ;;  %s2061_s19 = smov (!%p251_p9), 48  }
   0xf   : > { %s2062_s20 = smov (!%p251_p9), 45   ;;  %s2063_s21 = smov (!%p251_p9), 3  }
  0x10   : > { %s2064_s22 = smov (!%p251_p9), 125   ;;  %s2065_s23 = smov (!%p251_p9), 83  }
  0x11   : > { %s2066_s29 = smov (!%p251_p9), 80   ;;  %s2067_s16 = smov (!%p251_p9), 77  }
  0x13   : > { %s2161_s13 = scalar_select %p287_p10, %s2132_s28, 1  ;;  %v308_v32 = vlaneseq  ;;  %v2232_v36 = vld [vmem:[%s2638_s2] sm:$0x3]  ;;  %v2237_v37 = vld [vmem:[%s2638_s2 + $0x6] sm:$0x3]  ;;  %vm349_vm2 = vcmask 1043456  }
  0x14   : > { %v315_v40 = vperm.slane %v2232_v36, 0  ;;  %v316_v41 = vperm.slane %v2232_v36, 1  ;;  %v534_v42 = vperm.slane %v2237_v37, 0  ;;  %v535_v43 = vperm.slane %v2237_v37, 1  ;;  %v321_v53 = vld [vmem:[%s2639_s3] sm:$0xf] }
  0x15   : > { %s1935_s14 = sshll.u32 %s2161_s13, 3  ;;  %v2227_v35 = vand.u32 127, %v308_v32  ;;  %vm345_vm3 = vcmask 31744   ;;  %v2266_v54 = vld [vmem:[%s2638_s2 + $0x2] sm:$0x3] }
  0x16   : > { %s291_s17 = scalar_lea.vmem %s2636_s0, %s1935_s14  ;;  %s296_s15 = scalar_lea.vmem %s2637_s1, %s1935_s14  ;;  %v337_v59 = vperm.slane %v2266_v54, 0  ;;  %v338_v60 = vperm.slane %v2266_v54, 1  ;;  %v1885_v36 = vld [vmem:[%s2639_s3 + $0x30] sm:$0xf]  ;;  %v1915_v37 = vld [vmem:[%s2640_s4 + $0x4] sm:$0xf] }
  0x17   : > { %v2169_v0 = vld [vmem:[%s291_s17] sm:$0xff]  ;;  %vm310_vm0 = vcmp.lt.s32.totalorder %v2227_v35, 51  ;;  %vm528_vm1 = vcmp.lt.s32.totalorder %v2227_v35, 3  ;;  %vm331_vm4 = vcmp.lt.s32.totalorder %v2227_v35, 48  ;;  %vm454_vm5 = vcmp.lt.s32.totalorder %v2227_v35, 45 }
  0x18   : > { %299 = vst [vmem:[#allocation1] ss:$2 sm:$0xff] %v2169_v0  ;;  %v2203_v17 = vld [vmem:[%s296_s15] sm:$0xff]  ;;  %vm656_vm6 = vcmp.lt.s32.totalorder %v2227_v35, 125  ;;  %vm730_vm7 = vcmp.lt.s32.totalorder %v2227_v35, 83  ;;  %vm804_vm8 = vcmp.lt.s32.totalorder %v2227_v35, 80 }
  0x19   : > { %vm878_vm9 = vcmp.lt.s32.totalorder %v2227_v35, 77 }
  0x1f   : > { %v300_v1 = vld.sshfl [vmem:[#allocation1] sm:$0xff pattern:$0x75316420]  ;;  %v301_v2 = vld.sshfl [vmem:[#allocation1 + $0x8] sm:$0xff pattern:$0x75316420] }
  0x20   : > { %304 = vrot.lane.b32.xlu0 %v300_v1, %s2060_s18  ;;  %322 = vst [vmem:[#allocation1] ss:$2 sm:$0xff] %v2169_v0 }
  0x27   : > { %v323_v3 = vld.sshfl [vmem:[#allocation1] sm:$0xff pattern:$0x75316420]  ;;  %v324_v4 = vld.sshfl [vmem:[#allocation1 + $0x8] sm:$0xff pattern:$0x75316420] }
  0x28   : > { %327 = vrot.lane.b32.xlu1 %v323_v3, %s2061_s19  ;;  %306 = vrot.lane.b32.xlu0 %v301_v2, %s2060_s18  ;;  %445 = vst [vmem:[#allocation1] ss:$2 sm:$0xff] %v2169_v0  ;;  %v1820_v3 = vld [vmem:[%s2639_s3 + $0x4] sm:$0xf] }
  0x2f   : > { %v447_v5 = vld.sshfl [vmem:[#allocation1 + $0x8] sm:$0xff pattern:$0x75316420]  ;;  %v446_v6 = vld.sshfl [vmem:[#allocation1] sm:$0xff pattern:$0x75316420] }
  0x30   : > { %329 = vrot.lane.b32.xlu1 %v324_v4, %s2061_s19  ;;  %450 = vrot.lane.b32.xlu0 %v446_v6, %s2062_s20  ;;  %519 = vst [vmem:[#allocation1] ss:$2 sm:$0xff] %v2169_v0  ;;  %v2297_v4 = vld [vmem:[%s2638_s2 + $0x4] sm:$0x3] }
  0x37   : > { %v520_v7 = vld.sshfl [vmem:[#allocation1] sm:$0xff pattern:$0x75316420]  ;;  %v521_v8 = vld.sshfl [vmem:[#allocation1 + $0x8] sm:$0xff pattern:$0x75316420] }
  0x38   : > { %452 = vrot.lane.b32.xlu1 %v447_v5, %s2062_s20  ;;  %595 = vst [vmem:[#allocation1] ss:$2 sm:$0xff] %v2169_v0  ;;  %524 = vrot.lane.b32.xlu2 %v520_v7, %s2063_s21  ;;  %v1836_v5 = vld [vmem:[%s2639_s3 + $0xc] sm:$0xf] }
  0x3f   : > { %v2183_v9 = vld.sshfl [vmem:[#allocation1] sm:$0xff pattern:$0x75316420]  ;;  %v2185_v10 = vld.sshfl [vmem:[#allocation1 + $0x8] sm:$0xff pattern:$0x75316420] }
  0x40   : > { %647 = vst [vmem:[#allocation1] ss:$2 sm:$0xff] %v2169_v0  ;;  %526 = vrot.lane.b32.xlu2 %v521_v8, %s2063_s21  ;;  %v460_v8 = vperm.slane %v2297_v4, 0 }
  0x47   : > { %v649_v11 = vld.sshfl [vmem:[#allocation1 + $0x8] sm:$0xff pattern:$0x75316420]  ;;  %v648_v12 = vld.sshfl [vmem:[#allocation1] sm:$0xff pattern:$0x75316420] }
  0x48   : > { %654 = vrot.lane.b32.xlu0 %v649_v11, %s2064_s22  ;;  %721 = vst [vmem:[#allocation1] ss:$2 sm:$0xff] %v2169_v0  ;;  %652 = vrot.lane.b32.xlu2 %v648_v12, %s2064_s22  ;;  %v461_v11 = vperm.slane %v2297_v4, 1 }
  0x4f   : > { %v723_v13 = vld.sshfl [vmem:[#allocation1 + $0x8] sm:$0xff pattern:$0x75316420]  ;;  %v722_v14 = vld.sshfl [vmem:[#allocation1] sm:$0xff pattern:$0x75316420] }
  0x50   : > { %728 = vrot.lane.b32.xlu1 %v723_v13, %s2065_s23  ;;  %726 = vrot.lane.b32.xlu0 %v722_v14, %s2065_s23  ;;  %795 = vst [vmem:[#allocation1] ss:$2 sm:$0xff] %v2169_v0 }
  0x57   : > { %v796_v15 = vld.sshfl [vmem:[#allocation1] sm:$0xff pattern:$0x75316420]  ;;  %v797_v16 = vld.sshfl [vmem:[#allocation1 + $0x8] sm:$0xff pattern:$0x75316420] }
  0x58   : > { %800 = vrot.lane.b32.xlu1 %v796_v15, %s2066_s29  ;;  %869 = vst [vmem:[#allocation1] ss:$2 sm:$0xff] %v2169_v0  ;;  %802 = vrot.lane.b32.xlu2 %v797_v16, %s2066_s29 }
  0x5f   : > { %v870_v18 = vld.sshfl [vmem:[#allocation1] sm:$0xff pattern:$0x75316420]  ;;  %v871_v19 = vld.sshfl [vmem:[#allocation1 + $0x8] sm:$0xff pattern:$0x75316420] }
  0x60   : > { %874 = vrot.lane.b32.xlu1 %v870_v18, %s2067_s16  ;;  %968 = vst [vmem:[#allocation1] ss:$2 sm:$0xff] %v2203_v17  ;;  %876 = vrot.lane.b32.xlu2 %v871_v19, %s2067_s16  ;;  %v1830_v19 = vld [vmem:[%s2639_s3 + $0x8] sm:$0xf] }
  0x67   : > { %v969_v20 = vld.sshfl [vmem:[#allocation1] sm:$0xff pattern:$0x75316420]  ;;  %v970_v21 = vld.sshfl [vmem:[#allocation1 + $0x8] sm:$0xff pattern:$0x75316420] }
  0x68   : > { %983 = vst [vmem:[#allocation1] ss:$2 sm:$0xff] %v2203_v17 }
  0x6f   : > { %v985_v22 = vld.sshfl [vmem:[#allocation1 + $0x8] sm:$0xff pattern:$0x75316420]  ;;  %v984_v23 = vld.sshfl [vmem:[#allocation1] sm:$0xff pattern:$0x75316420] }
  0x70   : > { %990 = vrot.lane.b32.xlu0 %v985_v22, %s2061_s19  ;;  %1096 = vst [vmem:[#allocation1] ss:$2 sm:$0xff] %v2203_v17  ;;  %988 = vrot.lane.b32.xlu2 %v984_v23, %s2061_s19 }
  0x77   : > { %v1097_v24 = vld.sshfl [vmem:[#allocation1] sm:$0xff pattern:$0x75316420]  ;;  %v1098_v25 = vld.sshfl [vmem:[#allocation1 + $0x8] sm:$0xff pattern:$0x75316420] }
  0x78   : > { %1101 = vrot.lane.b32.xlu0 %v1097_v24, %s2062_s20  ;;  %1103 = vrot.lane.b32.xlu1 %v1098_v25, %s2062_s20  ;;  %1162 = vst [vmem:[#allocation1] ss:$2 sm:$0xff] %v2203_v17  ;;  %s1937_s20 = sshll.u32 %s2132_s28, 3 }
  0x79   : > { %973 = vrot.lane.b32.xlu2 %v969_v20, %s2060_s18  ;;  %v1841_v20 = vld [vmem:[%s2639_s3 + $0x10] sm:$0xf] }
  0x7f   : > { %v1163_v26 = vld.sshfl [vmem:[#allocation1] sm:$0xff pattern:$0x75316420]  ;;  %v1164_v27 = vld.sshfl [vmem:[#allocation1 + $0x8] sm:$0xff pattern:$0x75316420] }
  0x80   : > { %975 = vrot.lane.b32.xlu0 %v970_v21, %s2060_s18  ;;  %1167 = vrot.lane.b32.xlu1 %v1163_v26, %s2063_s21  ;;  %1230 = vst [vmem:[#allocation1] ss:$2 sm:$0xff] %v2203_v17  ;;  %v2340_v21 = vld [vmem:[%s2638_s2 + $0xa] sm:$0x3]  ;;  %s2016_s18 = scalar_lea.hbm %s2643_s7, 16 }
  0x81   : > { %1169 = vrot.lane.b32.xlu2 %v1164_v27, %s2063_s21  ;;  %v663_v22 = vperm.slane %v2340_v21, 1 }
  0x87   : > { %v2220_v28 = vld.sshfl [vmem:[#allocation1] sm:$0xff pattern:$0x75316420]  ;;  %v2222_v29 = vld.sshfl [vmem:[#allocation1 + $0x8] sm:$0xff pattern:$0x75316420] }
  0x88   : > { %1282 = vst [vmem:[#allocation1] ss:$2 sm:$0xff] %v2203_v17 }
  0x8f   : > { %v1283_v30 = vld.sshfl [vmem:[#allocation1] sm:$0xff pattern:$0x75316420]  ;;  %v1284_v31 = vld.sshfl [vmem:[#allocation1 + $0x8] sm:$0xff pattern:$0x75316420] }
  0x90   : > { %1348 = vst [vmem:[#allocation1] ss:$2 sm:$0xff] %v2203_v17  ;;  %1287 = vrot.lane.b32.xlu2 %v1283_v30, %s2064_s22  ;;  %v1847_v30 = vld [vmem:[%s2639_s3 + $0x14] sm:$0xf] }
  0x92   : > { %v305_v33 = vpop.permute.xlu0 %304  ;;  %v525_v34 = vpop.permute.xlu2 %524 }
  0x97   : > { %v1349_v38 = vld.sshfl [vmem:[#allocation1] sm:$0xff pattern:$0x75316420]  ;;  %v1350_v39 = vld.sshfl [vmem:[#allocation1 + $0x8] sm:$0xff pattern:$0x75316420] }
  0x98   : > { %1353 = vrot.lane.b32.xlu0 %v1349_v38, %s2065_s23  ;;  %1355 = vrot.lane.b32.xlu1 %v1350_v39, %s2065_s23  ;;  %1414 = vst [vmem:[#allocation1] ss:$2 sm:$0xff] %v2203_v17  ;;  %s1734_s23 = scalar_lea.hbm %s2643_s7, %s1937_s20 }
  0x99   : > { %s1738_s9 = sshll.u32 %s1734_s23, 4  ;;  %s1739_s9 = int_to_ptr.hbm [resolvable:$true] %s1738_s9 }
  0x9a   : > { %v328_v44 = vpop.permute.xlu1 %327  ;;  %v307_v45 = vpop.permute.xlu0 %306  ;;  %s2010_s28 = sshra.s32 %s1739_s9, 4  ;;  %s2011_s28 = int_to_ptr.hbm [resolvable:$true] %s2010_s28 }
  0x9b   : > { %v311_v46 = vsel %vm310_vm0, %v305_v33, %v307_v45  ;;  %v312_v47 = vsel %vm310_vm0, %v307_v45, %v305_v33  ;;  %v527_v48 = vpop.permute.xlu2 %526  ;;  %s2012_s13 = scalar_lea.hbm %s2011_s28, 8  ;;  %p2017_p0 = scmp.lt.s32.totalorder %s2011_s28, %s2643_s7 }
  0x9c   : > { %v319_v49 = vmul.f32 %v315_v40, %v312_v47  ;;  %v320_v50 = vmul.f32 %v316_v41, %v311_v46  ;;  %v529_v51 = vsel %vm528_vm1, %v525_v34, %v527_v48  ;;  %v530_v52 = vsel %vm528_vm1, %v527_v48, %v525_v34  ;;  %v1853_v47 = vld [vmem:[%s2639_s3 + $0x18] sm:$0xf]  ;;  %v2384_v48 = vld [vmem:[%s2638_s2 + $0xe] sm:$0x3]  ;;  %p2013_p11 = scmp.ne.s32.totalorder %s2011_s28, %s2012_s13  ;;  %p2018_p1 = scmp.lt.s32.totalorder %s2016_s18, %s2012_s13 }
  0x9d   : > { %v538_v55 = vmul.f32 %v534_v42, %v530_v52  ;;  %v539_v56 = vmul.f32 %v535_v43, %v529_v51  ;;  %v811_v51 = vperm.slane %v2384_v48, 1 }
  0x9e   : > { %1825 = vmatpush.msk.msra.mxu2 %vm349_vm2, %v319_v49  ;;  %1827 = vmatpush.msk.msra.mxu3 %vm349_vm2, %v320_v50  ;;  %v810_v50 = vperm.slane %v2384_v48, 0  ;;  %p2014_p12 = pnand %p2013_p11, %p2149_p5  ;;  %p2019_p2 = por %p2018_p1, %p2017_p0 }
  0x9f   : > { %v1415_v57 = vld.sshfl [vmem:[#allocation1] sm:$0xff pattern:$0x75316420]  ;;  %v1416_v58 = vld.sshfl [vmem:[#allocation1 + $0x8] sm:$0xff pattern:$0x75316420]  ;;  %1826 = vmatmul.msk.f32.vlgmr.msra.gmra.mxu2 %vm345_vm3, %v321_v53  ;;  %1828 = vmatmul.msk.f32.vlgmr.msra.gmra.mxu3 %vm345_vm3, %v321_v53 }
  0xa0   : > { %1480 = vst [vmem:[#allocation1] ss:$2 sm:$0xff] %v2203_v17  ;;  %1289 = vrot.lane.b32.xlu0 %v1284_v31, %s2064_s22  ;;  %1837 = vmatpush.msk.msrb.mxu2 %vm349_vm2, %v538_v55  ;;  %v2361_v31 = vld [vmem:[%s2638_s2 + $0xc] sm:$0x3]  ;;  %p2015_p13 = pneg %p2014_p12 }
  0xa1   : > { %1839 = vmatpush.msk.msrb.mxu3 %vm349_vm2, %v539_v56  ;;  %v736_v32 = vperm.slane %v2361_v31, 0  ;;  %v737_v33 = vperm.slane %v2361_v31, 1 }
  0xa2   : > { %v330_v61 = vpop.permute.xlu1 %329  ;;  %v451_v12 = vpop.permute.xlu0 %450  ;;  %p2020_p3 = pnand %p2019_p2, %p2015_p13 }
  0xa3   : > { %v332_v62 = vsel %vm331_vm4, %v328_v44, %v330_v61  ;;  %v333_v63 = vsel %vm331_vm4, %v330_v61, %v328_v44  ;;  %v2407_v61 = vld [vmem:[%s2638_s2 + $0x10] sm:$0x3] }
  0xa4   : > { %v341_v1 = vmul.f32 %v337_v59, %v333_v63  ;;  %v342_v2 = vmul.f32 %v338_v60, %v332_v62  ;;  %v884_v62 = vperm.slane %v2407_v61, 0  ;;  %v885_v63 = vperm.slane %v2407_v61, 1 }
  0xa6   : > { %1821 = vmatpush.msk.msra.mxu0 %vm349_vm2, %v341_v1  ;;  %1823 = vmatpush.msk.msra.mxu1 %vm349_vm2, %v342_v2 }
  0xa7   : > { %v1481_v6 = vld.sshfl [vmem:[#allocation1] sm:$0xff pattern:$0x75316420]  ;;  %v1482_v7 = vld.sshfl [vmem:[#allocation1 + $0x8] sm:$0xff pattern:$0x75316420]  ;;  %1822 = vmatmul.msk.f32.vlgmr.msra.gmra.mxu0 %vm345_vm3, %v1820_v3  ;;  %1824 = vmatmul.msk.f32.vlgmr.msra.gmra.mxu1 %vm345_vm3, %v1820_v3 }
  0xa8   : > { %1485 = vrot.lane.b32.xlu1 %v1481_v6, %s2067_s16  ;;  %1419 = vrot.lane.b32.xlu0 %v1415_v57, %s2066_s29 }
  0xa9   : > { %1487 = vrot.lane.b32.xlu2 %v1482_v7, %s2067_s16  ;;  %1838 = vmatmul.msk.f32.vlgmr.msrb.gmra.mxu2 %vm345_vm3, %v1836_v5  ;;  %s284_s16 = sand.u32 1, %s2050_s25  }
  0xaa   : > { %v453_v13 = vpop.permute.xlu1 %452  ;;  %1840 = vmatmul.msk.f32.vlgmr.msrb.gmra.mxu3 %vm345_vm3, %v1836_v5  ;;  %s1814_s19 = sshll.u32 %s284_s16, 3  ;;  %s1723_s15 = scalar_lea.sflag [#allocation3], %s284_s16 }
  0xab   : > { %v455_v14 = vsel %vm454_vm5, %v451_v12, %v453_v13  ;;  %v456_v15 = vsel %vm454_vm5, %v453_v13, %v451_v12  ;;  %v1865_v12 = vld [vmem:[%s2639_s3 + $0x20] sm:$0xf]  ;;  %v2068_v13 = vmov 0   ;;  %s286_s22 = scalar_lea.vmem [#allocation2], %s1814_s19 }
  0xac   : > { %v464_v16 = vmul.f32 %v460_v8, %v456_v15  ;;  %v465_v18 = vmul.f32 %v461_v11, %v455_v14  ;;  %1989 = vset.pattern.permute.xlu0 %v2068_v13  ;;  %v943_v14 = vld [vmem:[%s2640_s4] sm:$0xf]  ;;  %1988 = vset.pattern.permute.xlu2 %v2068_v13  ;;  %s1736_s8 = sshll.u32 %s286_s22, 4  ;;  %s1737_s8 = int_to_ptr.vmem [resolvable:$true] %s1736_s8 }
  0xae   : > { %1831 = vmatpush.msk.msrb.mxu0 %vm349_vm2, %v464_v16  ;;  %1833 = vmatpush.msk.msrb.mxu1 %vm349_vm2, %v465_v18 }
  0xaf   : > { %1832 = vmatmul.msk.f32.vlgmr.msrb.gmra.mxu0 %vm345_vm3, %v1830_v19  ;;  %1834 = vmatmul.msk.f32.vlgmr.msrb.gmra.mxu1 %vm345_vm3, %v1830_v19 }
  0xb0   : > { %1421 = vrot.lane.b32.xlu1 %v1416_v58, %s2066_s29  ;;  %1844 = vmatpush.msk.msra.mxu1 %vm349_vm2, %v2185_v10  ;;  %v662_v10 = vperm.slane %v2340_v21, 0  ;;  %v1859_v58 = vld [vmem:[%s2639_s3 + $0x1c] sm:$0xf] }
  0xb1   : > { %1842 = vmatpush.msk.msra.mxu0 %vm349_vm2, %v2183_v9  ;;  %v653_v9 = vpop.permute.xlu2 %652  ;;  %946 = vperm.xlu0 %1989, %v943_v14   ;;  %v1905_v14 = vld [vmem:[%s2639_s3 + $0x40] sm:$0xf] }
  0xb2   : > { %1550 = vperm.xlu2 %1988, %v1915_v37  }
  0xb7   : > { %1843 = vmatmul.msk.f32.vlgmr.msra.gmra.mxu0 %vm345_vm3, %v1841_v20  ;;  %1845 = vmatmul.msk.f32.vlgmr.msra.gmra.mxu1 %vm345_vm3, %v1841_v20 }
  0xb9   : > { %v803_v49 = vpop.permute.xlu2 %802 }
  0xba   : > { %v655_v23 = vpop.permute.xlu0 %654 }
  0xbb   : > { %v657_v24 = vsel %vm656_vm6, %v653_v9, %v655_v23  ;;  %v658_v25 = vsel %vm656_vm6, %v655_v23, %v653_v9  ;;  %v1871_v23 = vld [vmem:[%s2639_s3 + $0x28] sm:$0xf] }
  0xbc   : > { %v666_v26 = vmul.f32 %v662_v10, %v657_v24  ;;  %v667_v27 = vmul.f32 %v663_v22, %v658_v25 }
  0xbe   : > { %1848 = vmatpush.msk.msra.mxu2 %vm349_vm2, %v666_v26  ;;  %1850 = vmatpush.msk.msra.mxu3 %vm349_vm2, %v667_v27 }
  0xbf   : > { %1849 = vmatmul.msk.f32.vlgmr.msra.gmra.mxu2 %vm345_vm3, %v1847_v30  ;;  %1851 = vmatmul.msk.f32.vlgmr.msra.gmra.mxu3 %vm345_vm3, %v1847_v30  ;;  %v1880_v30 = vld [vmem:[%s2639_s3 + $0x2c] sm:$0xf] }
  0xc1   : > { %v877_v1 = vpop.permute.xlu2 %876 }
  0xc2   : > { %v729_v34 = vpop.permute.xlu1 %728  ;;  %v727_v38 = vpop.permute.xlu0 %726 }
  0xc3   : > { %v731_v39 = vsel %vm730_vm7, %v727_v38, %v729_v34  ;;  %v732_v44 = vsel %vm730_vm7, %v729_v34, %v727_v38 }
  0xc4   : > { %v740_v45 = vmul.f32 %v736_v32, %v731_v39  ;;  %v741_v46 = vmul.f32 %v737_v33, %v732_v44 }
  0xc6   : > { %1856 = vmatpush.msk.msrb.mxu1 %vm349_vm2, %v741_v46  ;;  %1854 = vmatpush.msk.msrb.mxu0 %vm349_vm2, %v740_v45  ;;  %v1870_v45 = vld [vmem:[%s2639_s3 + $0x24] sm:$0xf] }
  0xc7   : > { %1855 = vmatmul.msk.f32.vlgmr.msrb.gmra.mxu0 %vm345_vm3, %v1853_v47  ;;  %1857 = vmatmul.msk.f32.vlgmr.msrb.gmra.mxu1 %vm345_vm3, %v1853_v47 }
  0xca   : > { %v801_v52 = vpop.permute.xlu1 %800  ;;  %v989_v15 = vpop.permute.xlu2 %988 }
  0xcb   : > { %v805_v53 = vsel %vm804_vm8, %v801_v52, %v803_v49  ;;  %v806_v55 = vsel %vm804_vm8, %v803_v49, %v801_v52  ;;  %v1890_v49 = vld [vmem:[%s2639_s3 + $0x34] sm:$0xf] }
  0xcc   : > { %v814_v56 = vmul.f32 %v810_v50, %v805_v53  ;;  %v815_v57 = vmul.f32 %v811_v51, %v806_v55  ;;  %v1900_v55 = vld [vmem:[%s2639_s3 + $0x3c] sm:$0xf] }
  0xce   : > { %1860 = vmatpush.msk.msrb.mxu2 %vm349_vm2, %v814_v56  ;;  %1862 = vmatpush.msk.msrb.mxu3 %vm349_vm2, %v815_v57 }
  0xcf   : > { %1861 = vmatmul.msk.f32.vlgmr.msrb.gmra.mxu2 %vm345_vm3, %v1859_v58  ;;  %1863 = vmatmul.msk.f32.vlgmr.msrb.gmra.mxu3 %vm345_vm3, %v1859_v58 }
  0xd2   : > { %v875_v2 = vpop.permute.xlu1 %874 }
  0xd3   : > { %v879_v3 = vsel %vm878_vm9, %v875_v2, %v877_v1  ;;  %v880_v5 = vsel %vm878_vm9, %v877_v1, %v875_v2  ;;  %v974_v24 = vpop.permute.xlu2 %973  ;;  %v1895_v1 = vld [vmem:[%s2639_s3 + $0x38] sm:$0xf] }
  0xd4   : > { %v888_v6 = vmul.f32 %v884_v62, %v879_v3  ;;  %v889_v7 = vmul.f32 %v885_v63, %v880_v5 }
  0xd6   : > { %1868 = vmatpush.msk.msra.mxu1 %vm349_vm2, %v889_v7  ;;  %1866 = vmatpush.msk.msra.mxu0 %vm349_vm2, %v888_v6  ;;  %v1910_v6 = vld [vmem:[%s2639_s3 + $0x44] sm:$0xf] }
  0xd7   : > { %1867 = vmatmul.msk.f32.vlgmr.msra.gmra.mxu0 %vm345_vm3, %v1865_v12  ;;  %1869 = vmatmul.msk.f32.vlgmr.msra.gmra.mxu1 %vm345_vm3, %v1865_v12 }
  0xdb   : > { %v1170_v34 = vpop.permute.xlu2 %1169 }
  0xe2   : > { %v991_v16 = vpop.permute.xlu0 %990 }
  0xe3   : > { %v992_v18 = vsel %vm331_vm4, %v989_v15, %v991_v16  ;;  %v993_v19 = vsel %vm331_vm4, %v991_v16, %v989_v15 }
  0xe4   : > { %v994_v20 = vmul.f32 %v993_v19, %v337_v59  ;;  %v995_v9 = vmul.f32 %v992_v18, %v338_v60 }
  0xe6   : > { %1872 = vmatpush.msk.msra.mxu2 %vm349_vm2, %v994_v20  ;;  %1874 = vmatpush.msk.msra.mxu3 %vm349_vm2, %v995_v9 }
  0xe7   : > { %1873 = vmatmul.msk.f32.vlgmr.msra.gmra.mxu2 %vm345_vm3, %v1871_v23  ;;  %1875 = vmatmul.msk.f32.vlgmr.msra.gmra.mxu3 %vm345_vm3, %v1871_v23 }
  0xea   : > { %v1102_v25 = vpop.permute.xlu0 %1101  ;;  %v1104_v26 = vpop.permute.xlu1 %1103 }
  0xeb   : > { %v1105_v59 = vsel %vm454_vm5, %v1102_v25, %v1104_v26  ;;  %v1106_v54 = vsel %vm454_vm5, %v1104_v26, %v1102_v25  ;;  %v1288_v56 = vpop.permute.xlu2 %1287 }
  0xec   : > { %v1107_v60 = vmul.f32 %v1106_v54, %v460_v8  ;;  %v1108_v27 = vmul.f32 %v1105_v59, %v461_v11 }
  0xee   : > { %1881 = vmatpush.msk.msrb.mxu2 %vm349_vm2, %v1107_v60  ;;  %1883 = vmatpush.msk.msrb.mxu3 %vm349_vm2, %v1108_v27 }
  0xef   : > { %1882 = vmatmul.msk.f32.vlgmr.msrb.gmra.mxu2 %vm345_vm3, %v1880_v30  ;;  %1884 = vmatmul.msk.f32.vlgmr.msrb.gmra.mxu3 %vm345_vm3, %v1880_v30 }
  0xf0   : > { %1891 = vmatpush.msk.msra.mxu2 %vm349_vm2, %v2220_v28  ;;  %1893 = vmatpush.msk.msra.mxu3 %vm349_vm2, %v2222_v29 }
  0xf2   : > { %v976_v4 = vpop.permute.xlu0 %975  ;;  %v1168_v8 = vpop.permute.xlu1 %1167 }
  0xf3   : > { %v977_v11 = vsel %vm310_vm0, %v974_v24, %v976_v4  ;;  %v978_v38 = vsel %vm310_vm0, %v976_v4, %v974_v24  ;;  %v1171_v39 = vsel %vm528_vm1, %v1168_v8, %v1170_v34  ;;  %v1172_v44 = vsel %vm528_vm1, %v1170_v34, %v1168_v8 }
  0xf4   : > { %v979_v28 = vmul.f32 %v978_v38, %v315_v40  ;;  %v980_v29 = vmul.f32 %v977_v11, %v316_v41  ;;  %v1173_v46 = vmul.f32 %v1172_v44, %v534_v42  ;;  %v1174_v47 = vmul.f32 %v1171_v39, %v535_v43 }
  0xf6   : > { %1876 = vmatpush.msk.msrb.mxu0 %vm349_vm2, %v979_v28  ;;  %1878 = vmatpush.msk.msrb.mxu1 %vm349_vm2, %v980_v29 }
  0xf7   : > { %1877 = vmatmul.msk.f32.vlgmr.msrb.gmra.mxu0 %vm345_vm3, %v1870_v45  ;;  %1879 = vmatmul.msk.f32.vlgmr.msrb.gmra.mxu1 %vm345_vm3, %v1870_v45 }
  0xf8   : > { %1892 = vmatmul.msk.f32.vlgmr.msra.gmra.mxu2 %vm345_vm3, %v1890_v49  ;;  %1894 = vmatmul.msk.f32.vlgmr.msra.gmra.mxu3 %vm345_vm3, %v1890_v49 }
  0xf9   : > { %1886 = vmatpush.msk.msra.mxu0 %vm349_vm2, %v1173_v46  ;;  %1888 = vmatpush.msk.msra.mxu1 %vm349_vm2, %v1174_v47 }
  0xff   : > { %1887 = vmatmul.msk.f32.vlgmr.msra.gmra.mxu0 %vm345_vm3, %v1885_v36  ;;  %1889 = vmatmul.msk.f32.vlgmr.msra.gmra.mxu1 %vm345_vm3, %v1885_v36 }
 0x103   : > { %v1488_v2 = vpop.permute.xlu2 %1487 }
 0x10a   : > { %v1354_v40 = vpop.permute.xlu0 %1353  ;;  %v1356_v41 = vpop.permute.xlu1 %1355 }
 0x10b   : > { %v1357_v42 = vsel %vm730_vm7, %v1354_v40, %v1356_v41  ;;  %v1358_v43 = vsel %vm730_vm7, %v1356_v41, %v1354_v40 }
 0x10c   : > { %v1359_v52 = vmul.f32 %v1357_v42, %v736_v32  ;;  %v1360_v53 = vmul.f32 %v1358_v43, %v737_v33 }
 0x10e   : > { %1903 = vmatpush.msk.msrb.mxu3 %vm349_vm2, %v1360_v53  ;;  %1901 = vmatpush.msk.msrb.mxu2 %vm349_vm2, %v1359_v52 }
 0x10f   : > { %1902 = vmatmul.msk.f32.vlgmr.msrb.gmra.mxu2 %vm345_vm3, %v1900_v55  ;;  %1904 = vmatmul.msk.f32.vlgmr.msrb.gmra.mxu3 %vm345_vm3, %v1900_v55 }
 0x112   : > { %v1290_v57 = vpop.permute.xlu0 %1289 }
 0x113   : > { %v1291_v32 = vsel %vm656_vm6, %v1288_v56, %v1290_v57  ;;  %v1292_v31 = vsel %vm656_vm6, %v1290_v57, %v1288_v56 }
 0x114   : > { %v1293_v33 = vmul.f32 %v1291_v32, %v662_v10  ;;  %v1294_v58 = vmul.f32 %v1292_v31, %v663_v22 }
 0x116   : > { %1896 = vmatpush.msk.msrb.mxu0 %vm349_vm2, %v1293_v33  ;;  %1898 = vmatpush.msk.msrb.mxu1 %vm349_vm2, %v1294_v58 }
 0x117   : > { %1897 = vmatmul.msk.f32.vlgmr.msrb.gmra.mxu0 %vm345_vm3, %v1895_v1  ;;  %1899 = vmatmul.msk.f32.vlgmr.msrb.gmra.mxu1 %vm345_vm3, %v1895_v1 }
 0x11a   : > { %v1486_v3 = vpop.permute.xlu1 %1485  ;;  %v1420_v7 = vpop.permute.xlu0 %1419 }
 0x11b   : > { %v1489_v10 = vsel %vm878_vm9, %v1486_v3, %v1488_v2  ;;  %v1490_v21 = vsel %vm878_vm9, %v1488_v2, %v1486_v3 }
 0x11c   : > { %v1491_v22 = vmul.f32 %v1489_v10, %v884_v62  ;;  %v1492_v5 = vmul.f32 %v1490_v21, %v885_v63 }
 0x11e   : > { %1911 = vmatpush.msk.msra.mxu2 %vm349_vm2, %v1491_v22  ;;  %1913 = vmatpush.msk.msra.mxu3 %vm349_vm2, %v1492_v5 }
 0x11f   : > { %1912 = vmatmul.msk.f32.vlgmr.msra.gmra.mxu2 %vm345_vm3, %v1910_v6  ;;  %1914 = vmatmul.msk.f32.vlgmr.msra.gmra.mxu3 %vm345_vm3, %v1910_v6 }
 0x122   : > { %v1422_v12 = vpop.permute.xlu1 %1421  ;;  %v422_v16 = vpop.f32.mrf.mxu2 }
 0x123   : > { %v1423_v62 = vsel %vm804_vm8, %v1420_v7, %v1422_v12  ;;  %v1424_v61 = vsel %vm804_vm8, %v1422_v12, %v1420_v7  ;;  %v442_v18 = vpop.f32.mrf.mxu3  ;;  %v947_v47 = vpop.permute.xlu0 %946 }
 0x124   : > { %v1425_v63 = vmul.f32 %v1423_v62, %v810_v50  ;;  %v1426_v13 = vmul.f32 %v1424_v61, %v811_v51  ;;  %v373_v35 = vpop.f32.mrf.mxu0  ;;  %v393_v15 = vpop.f32.mrf.mxu1 }
 0x125   : > { %v423_v48 = vadd.f32 %v422_v16, %v373_v35  ;;  %v443_v51 = vadd.f32 %v442_v18, %v393_v15 }
 0x126   : > { %1906 = vmatpush.msk.msra.mxu0 %vm349_vm2, %v1425_v63  ;;  %1908 = vmatpush.msk.msra.mxu1 %vm349_vm2, %v1426_v13 }
 0x127   : > { %1907 = vmatmul.msk.f32.vlgmr.msra.gmra.mxu0 %vm345_vm3, %v1905_v14  ;;  %1909 = vmatmul.msk.f32.vlgmr.msra.gmra.mxu1 %vm345_vm3, %v1905_v14 }
 0x12c   : > { %v494_v50 = vpop.f32.mrf.mxu0  ;;  %v514_v19 = vpop.f32.mrf.mxu1 }
 0x12d   : > { %v568_v20 = vpop.f32.mrf.mxu2  ;;  %v588_v9 = vpop.f32.mrf.mxu3  ;;  %v517_v23 = vadd.f32 %v494_v50, %v423_v48  ;;  %v518_v24 = vadd.f32 %v514_v19, %v443_v51 }
 0x12f   : > { %v591_v59 = vadd.f32 %v568_v20, %v517_v23  ;;  %v592_v54 = vadd.f32 %v588_v9, %v518_v24 }
 0x134   : > { %v622_v25 = vpop.f32.mrf.mxu0  ;;  %v642_v26 = vpop.f32.mrf.mxu1 }
 0x135   : > { %v645_v60 = vadd.f32 %v622_v25, %v591_v59  ;;  %v646_v27 = vadd.f32 %v642_v26, %v592_v54  ;;  %v1551_v25 = vpop.permute.xlu2 %1550 }
 0x142   : > { %v696_v30 = vpop.f32.mrf.mxu2  ;;  %v716_v34 = vpop.f32.mrf.mxu3 }
 0x143   : > { %v719_v11 = vadd.f32 %v696_v30, %v645_v60  ;;  %v720_v38 = vadd.f32 %v716_v34, %v646_v27 }
 0x144   : > { %v770_v4 = vpop.f32.mrf.mxu0  ;;  %v790_v8 = vpop.f32.mrf.mxu1 }
 0x145   : > { %v793_v39 = vadd.f32 %v770_v4, %v719_v11  ;;  %v794_v44 = vadd.f32 %v790_v8, %v720_v38  ;;  %v2069_v11 = vmov 256.0  }
 0x146   : > { %1990 = vrcp.f32 %v2069_v11 }
 0x14c   : > { %v1991_v38 = vpop.eup %1990 }
 0x14d   : > { %vm963_vm10 = vweird.f32 %v1991_v38 }
 0x152   : > { %v844_v28 = vpop.f32.mrf.mxu2  ;;  %v864_v29 = vpop.f32.mrf.mxu3 }
 0x153   : > { %v867_v45 = vadd.f32 %v844_v28, %v793_v39  ;;  %v868_v46 = vadd.f32 %v864_v29, %v794_v44  ;;  %v959_v39 = vmul.f32 256.0, %v1991_v38 }
 0x154   : > { %v918_v49 = vpop.f32.mrf.mxu0  ;;  %v938_v36 = vpop.f32.mrf.mxu1 }
 0x155   : > { %v941_v37 = vadd.f32 %v918_v49, %v867_v45  ;;  %v942_v40 = vadd.f32 %v938_v36, %v868_v46  ;;  %v960_v44 = vsub.f32 1.0, %v959_v39  ;;  %v1563_v49 = vld [vmem:[%s2641_s5] sm:$0xf] }
 0x157   : > { %v949_v41 = vadd.f32 %v947_v47, %v941_v37  ;;  %v950_v42 = vadd.f32 %v947_v47, %v942_v40  ;;  %v961_v28 = vmul.f32 %v1991_v38, %v960_v44  ;;  %v1918_v40 = vld [vmem:[%s2641_s5 + $0x4] sm:$0xf] }
 0x159   : > { %v951_v43 = vmax.f32 %v949_v41, 0.0  ;;  %v952_v52 = vmax.f32 %v950_v42, 0.0  ;;  %v962_v29 = vadd.f32 %v1991_v38, %v961_v28  ;;  %v1564_v41 = vld [vmem:[%s2642_s6] sm:$0xf] }
 0x15b   : > { %v953_v53 = vsel %vm349_vm2, %v951_v43, 0.0  ;;  %v954_v55 = vsel %vm349_vm2, %v952_v52, 0.0  ;;  %v964_v45 = vsel %vm963_vm10, %v1991_v38, %v962_v29 }
 0x15c   : > { %v955_v56 = vadd.f32 %v954_v55, %v953_v53  ;;  %v1922_v53 = vld [vmem:[%s2641_s5 + $0x8] sm:$0xf]  ;;  %v1919_v55 = vld [vmem:[%s2642_s6 + $0x4] sm:$0xf] }
 0x15e   : > { %956 = vadd.xlane.f32.xlu2 %v955_v56 }
 0x16a   : > { %v1024_v57 = vpop.f32.mrf.mxu2  ;;  %v1044_v32 = vpop.f32.mrf.mxu3 }
 0x172   : > { %v1137_v31 = vpop.f32.mrf.mxu2  ;;  %v1157_v33 = vpop.f32.mrf.mxu3 }
 0x174   : > { %v1073_v58 = vpop.f32.mrf.mxu0  ;;  %v1093_v1 = vpop.f32.mrf.mxu1 }
 0x175   : > { %v1074_v2 = vadd.f32 %v1073_v58, %v1024_v57  ;;  %v1094_v3 = vadd.f32 %v1093_v1, %v1044_v32 }
 0x177   : > { %v1160_v6 = vadd.f32 %v1137_v31, %v1074_v2  ;;  %v1161_v7 = vadd.f32 %v1157_v33, %v1094_v3  ;;  %v1926_v31 = vld [vmem:[%s2641_s5 + $0xc] sm:$0xf] }
 0x178   : > { %v1927_v33 = vld [vmem:[%s2642_s6 + $0xc] sm:$0xf] }
 0x17b   : > { %v1257_v10 = vpop.f32.mrf.mxu2  ;;  %v1277_v21 = vpop.f32.mrf.mxu3 }
 0x17c   : > { %v1203_v22 = vpop.f32.mrf.mxu0  ;;  %v1223_v5 = vpop.f32.mrf.mxu1 }
 0x17d   : > { %v1226_v12 = vadd.f32 %v1203_v22, %v1160_v6  ;;  %v1227_v62 = vadd.f32 %v1223_v5, %v1161_v7  ;;  %v1923_v5 = vld [vmem:[%s2642_s6 + $0x8] sm:$0xf] }
 0x17f   : > { %v1280_v35 = vadd.f32 %v1257_v10, %v1226_v12  ;;  %v1281_v15 = vadd.f32 %v1277_v21, %v1227_v62 }
 0x192   : > { %v1389_v61 = vpop.f32.mrf.mxu2  ;;  %v1409_v63 = vpop.f32.mrf.mxu3 }
 0x194   : > { %v1323_v13 = vpop.f32.mrf.mxu0  ;;  %v1343_v14 = vpop.f32.mrf.mxu1 }
 0x195   : > { %v1346_v16 = vadd.f32 %v1323_v13, %v1280_v35  ;;  %v1347_v18 = vadd.f32 %v1343_v14, %v1281_v15 }
 0x197   : > { %v1412_v50 = vadd.f32 %v1389_v61, %v1346_v16  ;;  %v1413_v19 = vadd.f32 %v1409_v63, %v1347_v18 }
 0x1a2   : > { %v1521_v48 = vpop.f32.mrf.mxu2  ;;  %v1541_v51 = vpop.f32.mrf.mxu3 }
 0x1a4   : > { %v1455_v20 = vpop.f32.mrf.mxu0  ;;  %v1475_v9 = vpop.f32.mrf.mxu1 }
 0x1a5   : > { %v1478_v23 = vadd.f32 %v1455_v20, %v1412_v50  ;;  %v1479_v24 = vadd.f32 %v1475_v9, %v1413_v19 }
 0x1a7   : > { %v1544_v26 = vadd.f32 %v1521_v48, %v1478_v23  ;;  %v1545_v59 = vadd.f32 %v1541_v51, %v1479_v24  ;;  %v2070_v24 = vmov 839922192  }
 0x1a9   : > { %v1553_v54 = vadd.f32 %v1551_v25, %v1544_v26  ;;  %v1554_v60 = vadd.f32 %v1551_v25, %v1545_v59  ;;  %v1716_v25 = vunpack.c.l.s4 %v2070_v24  ;;  %v1710_v59 = vmul.f32 %v2203_v17, %v2169_v0 }
 0x1ab   : > { %v1555_v27 = vmax.f32 %v1553_v54, 0.0  ;;  %v1556_v30 = vmax.f32 %v1554_v60, 0.0  ;;  %v1717_v26 = vunpack.c.0.s8 %v1716_v25 }
 0x1ad   : > { %v1557_v34 = vsel %vm349_vm2, %v1555_v27, 0.0  ;;  %v1558_v4 = vsel %vm349_vm2, %v1556_v30, 0.0 }
 0x1ae   : > { %v1559_v8 = vadd.f32 %v1558_v4, %v1557_v34 }
 0x1b0   : > { %1560 = vadd.xlane.f32.xlu1 %v1559_v8 }
 0x1d1   : > { %v957_v46 = vpop.xlane.xlu2 %956 }
 0x1d2   : > { %v965_v47 = vmul.f32 %v964_v45, %v957_v46 }
 0x1d4   : > { %1916 = vmatpush.msk.msrb.mxu0 %vm349_vm2, %v965_v47 }
 0x1d5   : > { %1917 = vmatmul.msk.f32.vlgmr.msrb.gmra.mxu0 %vm345_vm3, %v1563_v49 }
 0x223   : > { %v1561_v36 = vpop.xlane.xlu1 %1560 }
 0x224   : > { %v1562_v37 = vmul.f32 %v1561_v36, %v964_v45 }
 0x226   : > { %1920 = vmatpush.msk.msrb.mxu1 %vm349_vm2, %v1562_v37 }
 0x227   : > { %1921 = vmatmul.msk.f32.vlgmr.msrb.gmra.mxu1 %vm345_vm3, %v1918_v40 }
 0x252   : > { %v1588_v42 = vpop.f32.mrf.mxu0 }
 0x253   : > { %v1589_v43 = vadd.f32 %v1588_v42, %v1564_v41 }
 0x255   : > { %v1591_v52 = vmax.f32 %v1589_v43, 0.0 }
 0x257   : > { %1924 = vmatpush.msk.msrb.mxu2 %vm349_vm2, %v1591_v52 }
 0x258   : > { %1925 = vmatmul.msk.f32.vlgmr.msrb.gmra.mxu2 %vm345_vm3, %v1922_v53 }
 0x2a4   : > { %v1619_v56 = vpop.f32.mrf.mxu1 }
 0x2a5   : > { %v1620_v57 = vadd.f32 %v1919_v55, %v1619_v56 }
 0x2a7   : > { %v1622_v32 = vmax.f32 %v1620_v57, 0.0 }
 0x2a9   : > { %1928 = vmatpush.msk.msrb.mxu3 %vm349_vm2, %v1622_v32 }
 0x2aa   : > { %1929 = vmatmul.msk.f32.vlgmr.msrb.gmra.mxu3 %vm345_vm3, %v1926_v31 }
 0x2db   : > { %v1650_v6 = vpop.f32.mrf.mxu2 }
 0x2dc   : > { %v1651_v7 = vadd.f32 %v1923_v5, %v1650_v6 }
 0x2de   : > { %v1653_v61 = vmax.f32 %v1651_v7, 0.0 }
 0x2e0   : > { %v1704_v16 = vmul.f32 2.0, %v1653_v61  ;;  %v1706_v51 = vperm.slane %v1653_v61, 0 }
 0x32d   : > { %v1681_v58 = vpop.f32.mrf.mxu3 }
 0x32e   : > { %v1682_v1 = vadd.f32 %v1927_v33, %v1681_v58 }
 0x330   : > { %v1684_v2 = vmax.f32 %v1682_v1, 0.0 }
 0x332   : > { %v1685_v3 = vsub.f32 0.0, %v1684_v2 }
 0x334   : > { %v1686_v10 = vmul.f32 1.442695, %v1685_v3 }
 0x336   : > { %1992 = vpow2.f32 %v1686_v10 }
 0x33c   : > { %v1993_v21 = vpop.eup %1992 }
 0x33d   : > { %v1688_v22 = vadd.f32 1.0, %v1993_v21 }
 0x33f   : > { %1994 = vrcp.f32 %v1688_v22  ;;  %v1700_v13 = vand.u32 2147483648, %v1688_v22  ;;  %v1698_v35 = vand.u32 2147483647, %v1688_v22  ;;  %vm1694_vm12 = vweird.f32 %v1688_v22 }
 0x341   : > { %v1701_v18 = vor.u32 1.1754944e-38, %v1700_v13  ;;  %vm1699_vm14 = vcmp.eq.f32.partialorder %v1698_v35, 8.507059e+37 }
 0x345   : > { %v1995_v12 = vpop.eup %1994 }
 0x346   : > { %v1690_v62 = vmul.f32 %v1995_v12, %v1688_v22  ;;  %vm1695_vm11 = vweird.f32 %v1995_v12 }
 0x347   : > { %vm1696_vm13 = vmor %vm1694_vm12, %vm1695_vm11 }
 0x348   : > { %v1691_v63 = vsub.f32 1.0, %v1690_v62 }
 0x34a   : > { %v1692_v14 = vmul.f32 %v1995_v12, %v1691_v63 }
 0x34c   : > { %v1693_v15 = vadd.f32 %v1995_v12, %v1692_v14 }
 0x34e   : > { %v1697_v50 = vsel %vm1696_vm13, %v1995_v12, %v1693_v15 }
 0x34f   : > { %v1702_v19 = vsel %vm1699_vm14, %v1701_v18, %v1697_v50 }
 0x350   : > { %v1705_v48 = vmul.f32 %v1704_v16, %v1702_v19  ;;  %v1708_v9 = vperm.slane %v1702_v19, 1 }
 0x352   : > { %v1707_v20 = vmul.f32 %v1706_v51, %v1705_v48 }
 0x354   : > { %v1709_v23 = vmul.f32 %v1708_v9, %v1707_v20 }
 0x356   : > { %1713 = vperm.xlu0 %1989, %v1709_v23  }
 0x3c8   : > { %v1714_v54 = vpop.permute.xlu0 %1713 }
 0x3c9   : > { %v1718_v60 = vperm.slane %v1714_v54, %v1717_v26 }
 0x3cb   : > { %v1720_v27 = vmul.f32 %v1718_v60, %v1710_v59 }
 0x3cd   : > { %1721 = vst [vmem:[%s286_s22] sm:$0xff] %v1720_v27 }
 0x3ce   : > { %2023 = shalt.err (!%p2020_p3)
}
 0x3cf   : > { %1938 = dma.vmem_to_hbm [thread:$0]  (%p2149_p5), %s1737_s8, 128, %s1739_s9, %s1723_s15  }
 0x3d0 PF: > { %p1944_p4 = scmp.ge.s32.totalorder %s2058_s27, 2  ;;  %s1750_s16 = sand.u32 1, %s2046_s24  }
 0x3d1   : > { %s1751_s21 = scalar_lea.sflag [#allocation3], %s1750_s16 }
 0x3d2   : > { %p1941_p7 = pnand %p1944_p4, %p2153_p6 }
 0x3d4   : > { %p1942_p8 = pneg %p1941_p7 }
 0x3d6   : > { %2041 = dma.done.wait (%p1942_p8), %s1751_s21, 128  }
 0x3d7   : > { %2043 = vsyncadd (%p1942_p8), %s1751_s21, 4294967168  ;;  %p17_p9 = scmp.ge.s32.totalorder %s2136_s30, 4   ;;  %s2646_s24 = smov %s2050_s25 }
 0x3d8   : > { %s2647_s25 = smov %s2054_s26  ;;  %s2648_s26 = smov %s2147_s10 }
 0x3d9   : > { %s2649_s27 = smov %s2136_s30  ;;  %19 = sbr.rel (!%p17_p9) target bundleno = 3 (0x3), region = 117 }
 0x3de   :  { %1757 = vsyncpa [#allocation3], 1 }
 0x3df   :  { %1759 = vsyncpa [#allocation3 + $0x1], 1 }

</bundles_post_ra>
